<compile_context>
chip_gen: v7x
topology: tpu7x:2x2x1
jax: 0.10.0
libtpu: 0.0.40
codegen_flags: <defaults>
</compile_context>

<pallas_src>
import functools
import math

import jax
import jax.numpy as jnp
from jax.experimental import pallas as pl
from jax.experimental.pallas import tpu as pltpu


# ----------------------------- kernel -------------------------------------- #

def _rmsnorm(x, w_row, eps):
    # x: (T, D) f32, w_row: (1, D) f32 -- statistics and scaling in f32.
    ms = jnp.mean(x * x, axis=-1, keepdims=True)
    return x * jax.lax.rsqrt(ms + eps) * w_row


def llama_layers_kernel(
    x_ref, anw_ref, wqkv_ref, wo_ref, fnw_ref, w13_ref, w2_ref, final_nw_ref,
    out_ref, h_ref,
    *, n_heads, kv_heads, head_dim, hidden, eps,
):
    layer = pl.program_id(1)
    n_layers = pl.num_programs(1)
    T, D = h_ref.shape
    n_rep = n_heads // kv_heads
    hd = head_dim
    scale = 1.0 / math.sqrt(hd)
    q_w = n_heads * hd
    kv_w = kv_heads * hd

    # Load the input activation once (first layer); afterwards the running
    # activation stays resident in VMEM scratch across the layer grid axis.
    @pl.when(layer == 0)
    def _():
        h_ref[...] = x_ref[...]

    h = h_ref[...]                                              # (T, D) f32

    # ---------------- attention ----------------
    xn = _rmsnorm(h, anw_ref[...], eps).astype(jnp.bfloat16)
    qkv = jnp.dot(xn, wqkv_ref[...],
                  preferred_element_type=jnp.float32)           # (T, (H+2KV)*hd)

    # Head-major stacks; softmax scale folded into Q; GQA via kv-head h//n_rep.
    q_heads = [qkv[:, i * hd:(i + 1) * hd] for i in range(n_heads)]
    k_heads = [qkv[:, q_w + g * hd: q_w + (g + 1) * hd] for g in range(kv_heads)]
    v_heads = [qkv[:, q_w + kv_w + g * hd: q_w + kv_w + (g + 1) * hd]
               for g in range(kv_heads)]
    q = (jnp.stack(q_heads, axis=0) * scale).astype(jnp.bfloat16)        # (H,T,hd)
    k = jnp.stack([k_heads[i // n_rep] for i in range(n_heads)],
                  axis=0).astype(jnp.bfloat16)                           # (H,T,hd)
    v = jnp.stack([v_heads[i // n_rep] for i in range(n_heads)],
                  axis=0).astype(jnp.bfloat16)                           # (H,T,hd)

    # Batched over heads, contracting head_dim (no explicit transpose).
    scores = jnp.einsum('hqc,hkc->hqk', q, k,
                        preferred_element_type=jnp.float32)              # (H,T,T)
    m = jnp.max(scores, axis=-1, keepdims=True)
    p = jnp.exp(scores - m)                                              # f32 softmax
    denom = jnp.sum(p, axis=-1, keepdims=True)
    probs = p * pl.reciprocal(denom, approx=True)

    attn = jnp.einsum('hqk,hkc->hqc', probs.astype(jnp.bfloat16), v,
                      preferred_element_type=jnp.float32)                # (H,T,hd)

    # Output projection with head-major Wo (H, hd, D): batched matmul per head,
    # then reduce over the (major) head axis -- no lane-dim concatenation.
    o = jnp.einsum('hqc,hcd->hqd', attn.astype(jnp.bfloat16), wo_ref[...],
                   preferred_element_type=jnp.float32)                   # (H,T,D)
    h = h + jnp.sum(o, axis=0)                                           # residual

    # ---------------- SwiGLU feed-forward ----------------
    hn = _rmsnorm(h, fnw_ref[...], eps).astype(jnp.bfloat16)
    gu = jnp.dot(hn, w13_ref[...],
                 preferred_element_type=jnp.float32)                     # (T, 2*HF)
    g = gu[:, :hidden]
    u = gu[:, hidden:]
    act = (g * jax.nn.sigmoid(g) * u).astype(jnp.bfloat16)               # SiLU(g)*u
    ff = jnp.dot(act, w2_ref[...], preferred_element_type=jnp.float32)   # (T, D)
    h = h + ff                                                           # residual

    h_ref[...] = h

    # Fused final RMSNorm on the last layer step.
    @pl.when(layer == n_layers - 1)
    def _():
        out_ref[...] = _rmsnorm(h, final_nw_ref[...], eps).astype(out_ref.dtype)


# ----------------------------- wrapper -------------------------------------- #

def llama_transformer_forward(x, params, *, n_heads, kv_heads, eps):
    """x: (B, T, D) float32; params: dict of stacked per-layer weights."""
    B, T, D = x.shape
    head_dim = D // n_heads
    L, _, qkv_w = params["wqkv"].shape
    hidden = params["w2"].shape[1]

    kernel = functools.partial(
        llama_layers_kernel,
        n_heads=n_heads, kv_heads=kv_heads, head_dim=head_dim,
        hidden=hidden, eps=eps)

    return pl.pallas_call(
        kernel,
        out_shape=jax.ShapeDtypeStruct((B, T, D), jnp.float32),
        grid_spec=pltpu.PrefetchScalarGridSpec(
            num_scalar_prefetch=0,
            grid=(B, L),
            in_specs=[
                pl.BlockSpec((None, T, D), lambda b, l: (b, 0, 0)),           # x
                pl.BlockSpec((None, 1, D), lambda b, l: (l, 0, 0)),           # attn norm w
                pl.BlockSpec((None, D, qkv_w), lambda b, l: (l, 0, 0)),       # fused Wq|Wk|Wv
                pl.BlockSpec((None, n_heads, head_dim, D),
                             lambda b, l: (l, 0, 0, 0)),                      # Wo (head-major)
                pl.BlockSpec((None, 1, D), lambda b, l: (l, 0, 0)),           # ffn norm w
                pl.BlockSpec((None, D, 2 * hidden), lambda b, l: (l, 0, 0)),  # fused W1|W3
                pl.BlockSpec((None, hidden, D), lambda b, l: (l, 0, 0)),      # W2
                pl.BlockSpec((1, D), lambda b, l: (0, 0)),                    # final norm w
            ],
            out_specs=pl.BlockSpec((None, T, D), lambda b, l: (b, 0, 0)),
            scratch_shapes=[pltpu.VMEM((T, D), jnp.float32)],                 # resident h
        ),
        compiler_params=pltpu.CompilerParams(
            dimension_semantics=("parallel", "arbitrary"),
            vmem_limit_bytes=64 * 1024 * 1024,
        ),
    )(x, params["attn_norm_w"], params["wqkv"], params["wo"],
      params["ffn_norm_w"], params["w13"], params["w2"], params["norm_w"])


def init_params(key, *, dim, n_heads, kv_heads, n_layers, first_layer, multiple_of):
    head_dim = dim // n_heads
    # FeedForward hidden dim exactly as the torch module computes it:
    hidden = 4 * dim
    hidden = int(7 * hidden / 8)
    hidden = multiple_of * ((hidden + multiple_of - 1) // multiple_of)
    L = n_layers - first_layer

    def lin(k, shape):
        # Deterministic init; stored pre-transposed ([in, out] / head-major) and
        # cast to bf16 for the MXU (matmuls still accumulate in f32).
        return (0.02 * jax.random.normal(k, shape, jnp.float32)).astype(jnp.bfloat16)

    k_qkv, k_o, k_13, k_2 = jax.random.split(key, 4)
    params = dict(
        attn_norm_w=jnp.ones((L, 1, dim), jnp.float32),
        wqkv=lin(k_qkv, (L, dim, (n_heads + 2 * kv_heads) * head_dim)),
        wo=lin(k_o, (L, n_heads, head_dim, dim)),
        ffn_norm_w=jnp.ones((L, 1, dim), jnp.float32),
        w13=lin(k_13, (L, dim, 2 * hidden)),
        w2=lin(k_2, (L, hidden, dim)),
        norm_w=jnp.ones((1, dim), jnp.float32),
    )
    return params, hidden


# ------------------------------- main -------------------------------------- #

if __name__ == "__main__":
    config = dict(dim=128, n_heads=4, kv_heads=2, n_layers=2, first_layer=0,
                  multiple_of=32, norm_eps=1e-6)
    B, T = 2, 8

    key = jax.random.PRNGKey(0)
    kx, kp = jax.random.split(key)
    x = jax.random.normal(kx, (B, T, config["dim"]), jnp.float32)

    params, ffn_hidden = init_params(
        kp, dim=config["dim"], n_heads=config["n_heads"],
        kv_heads=config["kv_heads"], n_layers=config["n_layers"],
        first_layer=config["first_layer"], multiple_of=config["multiple_of"])

    out = llama_transformer_forward(
        x, params, n_heads=config["n_heads"], kv_heads=config["kv_heads"],
        eps=config["norm_eps"])
    out = jax.block_until_ready(out)

    assert out.shape == (B, T, config["dim"]) and out.dtype == jnp.float32
    assert bool(jnp.all(jnp.isfinite(out)))
    print("KERNEL_OK")
</pallas_src>

<mosaic_0001>
module attributes {stable_mosaic.version = 11 : i64} {
  func.func @llama_layers_kernel(%arg0: i32, %arg1: i32, %arg2: memref<1x8x128xf32, #tpu.memory_space<vmem>>, %arg3: memref<1x1x128xf32, #tpu.memory_space<vmem>>, %arg4: memref<1x128x256xbf16, #tpu.memory_space<vmem>>, %arg5: memref<1x4x32x128xbf16, #tpu.memory_space<vmem>>, %arg6: memref<1x1x128xf32, #tpu.memory_space<vmem>>, %arg7: memref<1x128x896xbf16, #tpu.memory_space<vmem>>, %arg8: memref<1x448x128xbf16, #tpu.memory_space<vmem>>, %arg9: memref<1x128xf32, #tpu.memory_space<vmem>>, %arg10: memref<1x8x128xf32, #tpu.memory_space<vmem>>, %arg11: memref<8x128xf32, #tpu.memory_space<vmem>>) attributes {dimension_semantics = [#tpu.dimension_semantics<parallel>, #tpu.dimension_semantics<arbitrary>], iteration_bounds = array<i64: 2, 2>, scalar_prefetch = 0 : i64, scratch_operands = 1 : i64, tpu.core_type = #tpu.core_type<tc>, window_params = [{transform_indices = @transform_0, window_bounds = array<i64: 1, 8, 128>}, {transform_indices = @transform_1, window_bounds = array<i64: 1, 1, 128>}, {transform_indices = @transform_2, window_bounds = array<i64: 1, 128, 256>}, {transform_indices = @transform_3, window_bounds = array<i64: 1, 4, 32, 128>}, {transform_indices = @transform_4, window_bounds = array<i64: 1, 1, 128>}, {transform_indices = @transform_5, window_bounds = array<i64: 1, 128, 896>}, {transform_indices = @transform_6, window_bounds = array<i64: 1, 448, 128>}, {pipeline_mode = #tpu.pipeline_mode<synchronous>, transform_indices = @transform_7, window_bounds = array<i64: 1, 128>}, {transform_indices = @transform_8, window_bounds = array<i64: 1, 8, 128>}]} {
    %c0_i32 = arith.constant 0 : i32
    %0 = arith.cmpi eq, %arg1, %c0_i32 : i32
    %1 = arith.extui %0 : i1 to i32
    %c0_i32_0 = arith.constant 0 : i32
    %2 = arith.cmpi ne, %1, %c0_i32_0 : i32
    scf.if %2 {
      %c0_40 = arith.constant 0 : index
      %c0_41 = arith.constant 0 : index
      %c0_42 = arith.constant 0 : index
      %105 = vector.load %arg2[%c0_40, %c0_41, %c0_42] : memref<1x8x128xf32, #tpu.memory_space<vmem>>, vector<1x8x128xf32>
      %106 = vector.shape_cast %105 : vector<1x8x128xf32> to vector<8x128xf32>
      %c0_43 = arith.constant 0 : index
      %c0_44 = arith.constant 0 : index
      %107 = vector.load %arg11[%c0_43, %c0_44] : memref<8x128xf32, #tpu.memory_space<vmem>>, vector<8x128xf32>
      tpu.vector_store %arg11[%c0_43, %c0_44], %106 {strides = array<i32>} : memref<8x128xf32, #tpu.memory_space<vmem>>, vector<8x128xf32>,
    } else {
    }
    %c0 = arith.constant 0 : index
    %c0_1 = arith.constant 0 : index
    %3 = vector.load %arg11[%c0, %c0_1] : memref<8x128xf32, #tpu.memory_space<vmem>>, vector<8x128xf32>
    %c0_2 = arith.constant 0 : index
    %c0_3 = arith.constant 0 : index
    %c0_4 = arith.constant 0 : index
    %4 = vector.load %arg3[%c0_2, %c0_3, %c0_4] : memref<1x1x128xf32, #tpu.memory_space<vmem>>, vector<1x1x128xf32>
    %5 = vector.shape_cast %4 : vector<1x1x128xf32> to vector<1x128xf32>
    %6 = arith.mulf %3, %3 : vector<8x128xf32>
    %cst = arith.constant dense<0.000000e+00> : vector<8xf32>
    %7 = vector.multi_reduction <add>, %6, %cst [1] : vector<8x128xf32> to vector<8xf32>
    %8 = vector.shape_cast %7 : vector<8xf32> to vector<8x1xf32>
    %cst_5 = arith.constant 1.280000e+02 : f32
    %9 = vector.broadcast %cst_5 : f32 to vector<8x1xf32>
    %10 = arith.divf %8, %9 : vector<8x1xf32>
    %cst_6 = arith.constant 9.99999997E-7 : f32
    %11 = vector.broadcast %cst_6 : f32 to vector<8x1xf32>
    %12 = arith.addf %10, %11 : vector<8x1xf32>
    %13 = math.rsqrt %12 : vector<8x1xf32>
    %14 = vector.broadcast %13 : vector<8x1xf32> to vector<8x128xf32>
    %15 = arith.mulf %3, %14 : vector<8x128xf32>
    %16 = vector.broadcast %5 : vector<1x128xf32> to vector<8x128xf32>
    %17 = arith.mulf %15, %16 : vector<8x128xf32>
    %18 = arith.truncf %17 : vector<8x128xf32> to vector<8x128xbf16>
    %c0_7 = arith.constant 0 : index
    %c0_8 = arith.constant 0 : index
    %c0_9 = arith.constant 0 : index
    %19 = vector.load %arg4[%c0_7, %c0_8, %c0_9] : memref<1x128x256xbf16, #tpu.memory_space<vmem>>, vector<1x128x256xbf16>
    %20 = vector.shape_cast %19 : vector<1x128x256xbf16> to vector<128x256xbf16>
    %cst_10 = arith.constant dense<0.000000e+00> : vector<8x256xf32>
    %21 = tpu.matmul %18, %20, %cst_10 {dimension_numbers = #tpu.dot_dimension_numbers<[1], [0], [0], [1], [0, 0, 1, 1], [], []>} : vector<8x128xbf16>, vector<128x256xbf16>, vector<8x256xf32> -> vector<8x256xf32>
    %22 = vector.extract_strided_slice %21 {offsets = [0, 0], sizes = [8, 32], strides = [1, 1]} : vector<8x256xf32> to vector<8x32xf32>
    %23 = vector.extract_strided_slice %21 {offsets = [0, 32], sizes = [8, 32], strides = [1, 1]} : vector<8x256xf32> to vector<8x32xf32>
    %24 = vector.extract_strided_slice %21 {offsets = [0, 64], sizes = [8, 32], strides = [1, 1]} : vector<8x256xf32> to vector<8x32xf32>
    %25 = vector.extract_strided_slice %21 {offsets = [0, 96], sizes = [8, 32], strides = [1, 1]} : vector<8x256xf32> to vector<8x32xf32>
    %26 = vector.extract_strided_slice %21 {offsets = [0, 128], sizes = [8, 32], strides = [1, 1]} : vector<8x256xf32> to vector<8x32xf32>
    %27 = vector.extract_strided_slice %21 {offsets = [0, 160], sizes = [8, 32], strides = [1, 1]} : vector<8x256xf32> to vector<8x32xf32>
    %28 = vector.extract_strided_slice %21 {offsets = [0, 192], sizes = [8, 32], strides = [1, 1]} : vector<8x256xf32> to vector<8x32xf32>
    %29 = vector.extract_strided_slice %21 {offsets = [0, 224], sizes = [8, 32], strides = [1, 1]} : vector<8x256xf32> to vector<8x32xf32>
    %30 = vector.shape_cast %22 : vector<8x32xf32> to vector<1x8x32xf32>
    %31 = vector.shape_cast %23 : vector<8x32xf32> to vector<1x8x32xf32>
    %32 = vector.shape_cast %24 : vector<8x32xf32> to vector<1x8x32xf32>
    %33 = vector.shape_cast %25 : vector<8x32xf32> to vector<1x8x32xf32>
    %34 = tpu.concatenate %30, %31, %32, %33 in 0 : vector<1x8x32xf32>, vector<1x8x32xf32>, vector<1x8x32xf32>, vector<1x8x32xf32> -> vector<4x8x32xf32>
    %cst_11 = arith.constant 0.176776692 : f32
    %35 = vector.broadcast %cst_11 : f32 to vector<4x8x32xf32>
    %36 = arith.mulf %34, %35 : vector<4x8x32xf32>
    %37 = arith.truncf %36 : vector<4x8x32xf32> to vector<4x8x32xbf16>
    %38 = vector.shape_cast %26 : vector<8x32xf32> to vector<1x8x32xf32>
    %39 = vector.shape_cast %26 : vector<8x32xf32> to vector<1x8x32xf32>
    %40 = vector.shape_cast %27 : vector<8x32xf32> to vector<1x8x32xf32>
    %41 = vector.shape_cast %27 : vector<8x32xf32> to vector<1x8x32xf32>
    %42 = tpu.concatenate %38, %39, %40, %41 in 0 : vector<1x8x32xf32>, vector<1x8x32xf32>, vector<1x8x32xf32>, vector<1x8x32xf32> -> vector<4x8x32xf32>
    %43 = arith.truncf %42 : vector<4x8x32xf32> to vector<4x8x32xbf16>
    %44 = vector.shape_cast %28 : vector<8x32xf32> to vector<1x8x32xf32>
    %45 = vector.shape_cast %28 : vector<8x32xf32> to vector<1x8x32xf32>
    %46 = vector.shape_cast %29 : vector<8x32xf32> to vector<1x8x32xf32>
    %47 = vector.shape_cast %29 : vector<8x32xf32> to vector<1x8x32xf32>
    %48 = tpu.concatenate %44, %45, %46, %47 in 0 : vector<1x8x32xf32>, vector<1x8x32xf32>, vector<1x8x32xf32>, vector<1x8x32xf32> -> vector<4x8x32xf32>
    %49 = arith.truncf %48 : vector<4x8x32xf32> to vector<4x8x32xbf16>
    "tpu.trace_start"() <{level = 10 : i32, message = "hqc,hkc->hqk"}> : () -> ()
    %cst_12 = arith.constant dense<0.000000e+00> : vector<4x8x8xf32>
    %50 = tpu.matmul %37, %43, %cst_12 {dimension_numbers = #tpu.dot_dimension_numbers<[2], [2], [1], [1], [0, 0, 0, 1, 1, 1], [0], [0]>} : vector<4x8x32xbf16>, vector<4x8x32xbf16>, vector<4x8x8xf32> -> vector<4x8x8xf32>
    "tpu.trace_stop"() : () -> ()
    %cst_13 = arith.constant dense<0xFF800000> : vector<4x8xf32>
    %51 = vector.multi_reduction <maximumf>, %50, %cst_13 [2] : vector<4x8x8xf32> to vector<4x8xf32>
    %52 = vector.shape_cast %51 : vector<4x8xf32> to vector<4x8x1xf32>
    %53 = vector.broadcast %52 : vector<4x8x1xf32> to vector<4x8x8xf32>
    %54 = arith.subf %50, %53 : vector<4x8x8xf32>
    %55 = math.exp %54 : vector<4x8x8xf32>
    %cst_14 = arith.constant dense<0.000000e+00> : vector<4x8xf32>
    %56 = vector.multi_reduction <add>, %55, %cst_14 [2] : vector<4x8x8xf32> to vector<4x8xf32>
    %57 = vector.shape_cast %56 : vector<4x8xf32> to vector<4x8x1xf32>
    %58 = tpu.reciprocal %57 {approx = true} : vector<4x8x1xf32> -> vector<4x8x1xf32>
    %59 = vector.broadcast %58 : vector<4x8x1xf32> to vector<4x8x8xf32>
    %60 = arith.mulf %55, %59 : vector<4x8x8xf32>
    %61 = arith.truncf %60 : vector<4x8x8xf32> to vector<4x8x8xbf16>
    "tpu.trace_start"() <{level = 10 : i32, message = "hqk,hkc->hqc"}> : () -> ()
    %cst_15 = arith.constant dense<0.000000e+00> : vector<4x8x32xf32>
    %62 = tpu.matmul %61, %49, %cst_15 {dimension_numbers = #tpu.dot_dimension_numbers<[2], [1], [1], [2], [0, 0, 0, 1, 1, 2], [0], [0]>} : vector<4x8x8xbf16>, vector<4x8x32xbf16>, vector<4x8x32xf32> -> vector<4x8x32xf32>
    "tpu.trace_stop"() : () -> ()
    %63 = arith.truncf %62 : vector<4x8x32xf32> to vector<4x8x32xbf16>
    %c0_16 = arith.constant 0 : index
    %c0_17 = arith.constant 0 : index
    %c0_18 = arith.constant 0 : index
    %c0_19 = arith.constant 0 : index
    %64 = vector.load %arg5[%c0_16, %c0_17, %c0_18, %c0_19] : memref<1x4x32x128xbf16, #tpu.memory_space<vmem>>, vector<1x4x32x128xbf16>
    %65 = vector.shape_cast %64 : vector<1x4x32x128xbf16> to vector<4x32x128xbf16>
    "tpu.trace_start"() <{level = 10 : i32, message = "hqc,hcd->hqd"}> : () -> ()
    %cst_20 = arith.constant dense<0.000000e+00> : vector<4x8x128xf32>
    %66 = tpu.matmul %63, %65, %cst_20 {dimension_numbers = #tpu.dot_dimension_numbers<[2], [1], [1], [2], [0, 0, 0, 1, 1, 2], [0], [0]>} : vector<4x8x32xbf16>, vector<4x32x128xbf16>, vector<4x8x128xf32> -> vector<4x8x128xf32>
    "tpu.trace_stop"() : () -> ()
    %cst_21 = arith.constant dense<0.000000e+00> : vector<8x128xf32>
    %67 = vector.multi_reduction <add>, %66, %cst_21 [0] : vector<4x8x128xf32> to vector<8x128xf32>
    %68 = arith.addf %3, %67 : vector<8x128xf32>
    %c0_22 = arith.constant 0 : index
    %c0_23 = arith.constant 0 : index
    %c0_24 = arith.constant 0 : index
    %69 = vector.load %arg6[%c0_22, %c0_23, %c0_24] : memref<1x1x128xf32, #tpu.memory_space<vmem>>, vector<1x1x128xf32>
    %70 = vector.shape_cast %69 : vector<1x1x128xf32> to vector<1x128xf32>
    %71 = arith.mulf %68, %68 : vector<8x128xf32>
    %cst_25 = arith.constant dense<0.000000e+00> : vector<8xf32>
    %72 = vector.multi_reduction <add>, %71, %cst_25 [1] : vector<8x128xf32> to vector<8xf32>
    %73 = vector.shape_cast %72 : vector<8xf32> to vector<8x1xf32>
    %cst_26 = arith.constant 1.280000e+02 : f32
    %74 = vector.broadcast %cst_26 : f32 to vector<8x1xf32>
    %75 = arith.divf %73, %74 : vector<8x1xf32>
    %cst_27 = arith.constant 9.99999997E-7 : f32
    %76 = vector.broadcast %cst_27 : f32 to vector<8x1xf32>
    %77 = arith.addf %75, %76 : vector<8x1xf32>
    %78 = math.rsqrt %77 : vector<8x1xf32>
    %79 = vector.broadcast %78 : vector<8x1xf32> to vector<8x128xf32>
    %80 = arith.mulf %68, %79 : vector<8x128xf32>
    %81 = vector.broadcast %70 : vector<1x128xf32> to vector<8x128xf32>
    %82 = arith.mulf %80, %81 : vector<8x128xf32>
    %83 = arith.truncf %82 : vector<8x128xf32> to vector<8x128xbf16>
    %c0_28 = arith.constant 0 : index
    %c0_29 = arith.constant 0 : index
    %c0_30 = arith.constant 0 : index
    %84 = vector.load %arg7[%c0_28, %c0_29, %c0_30] : memref<1x128x896xbf16, #tpu.memory_space<vmem>>, vector<1x128x896xbf16>
    %85 = vector.shape_cast %84 : vector<1x128x896xbf16> to vector<128x896xbf16>
    %cst_31 = arith.constant dense<0.000000e+00> : vector<8x896xf32>
    %86 = tpu.matmul %83, %85, %cst_31 {dimension_numbers = #tpu.dot_dimension_numbers<[1], [0], [0], [1], [0, 0, 1, 1], [], []>} : vector<8x128xbf16>, vector<128x896xbf16>, vector<8x896xf32> -> vector<8x896xf32>
    %87 = vector.extract_strided_slice %86 {offsets = [0, 0], sizes = [8, 448], strides = [1, 1]} : vector<8x896xf32> to vector<8x448xf32>
    %88 = vector.extract_strided_slice %86 {offsets = [0, 448], sizes = [8, 448], strides = [1, 1]} : vector<8x896xf32> to vector<8x448xf32>
    %89 = arith.negf %87 : vector<8x448xf32>
    %90 = math.exp %89 : vector<8x448xf32>
    %cst_32 = arith.constant 1.000000e+00 : f32
    %91 = vector.broadcast %cst_32 : f32 to vector<8x448xf32>
    %92 = arith.addf %91, %90 : vector<8x448xf32>
    %93 = arith.divf %91, %92 : vector<8x448xf32>
    %94 = arith.mulf %87, %93 : vector<8x448xf32>
    %95 = arith.mulf %94, %88 : vector<8x448xf32>
    %96 = arith.truncf %95 : vector<8x448xf32> to vector<8x448xbf16>
    %c0_33 = arith.constant 0 : index
    %c0_34 = arith.constant 0 : index
    %c0_35 = arith.constant 0 : index
    %97 = vector.load %arg8[%c0_33, %c0_34, %c0_35] : memref<1x448x128xbf16, #tpu.memory_space<vmem>>, vector<1x448x128xbf16>
    %98 = vector.shape_cast %97 : vector<1x448x128xbf16> to vector<448x128xbf16>
    %cst_36 = arith.constant dense<0.000000e+00> : vector<8x128xf32>
    %99 = tpu.matmul %96, %98, %cst_36 {dimension_numbers = #tpu.dot_dimension_numbers<[1], [0], [0], [1], [0, 0, 1, 1], [], []>} : vector<8x448xbf16>, vector<448x128xbf16>, vector<8x128xf32> -> vector<8x128xf32>
    %100 = arith.addf %68, %99 : vector<8x128xf32>
    %c0_37 = arith.constant 0 : index
    %c0_38 = arith.constant 0 : index
    %101 = vector.load %arg11[%c0_37, %c0_38] : memref<8x128xf32, #tpu.memory_space<vmem>>, vector<8x128xf32>
    tpu.vector_store %arg11[%c0_37, %c0_38], %100 {strides = array<i32>} : memref<8x128xf32, #tpu.memory_space<vmem>>, vector<8x128xf32>,
    %c1_i32 = arith.constant 1 : i32
    %102 = arith.cmpi eq, %arg1, %c1_i32 : i32
    %103 = arith.extui %102 : i1 to i32
    %c0_i32_39 = arith.constant 0 : i32
    %104 = arith.cmpi ne, %103, %c0_i32_39 : i32
    scf.if %104 {
      %c0_40 = arith.constant 0 : index
      %c0_41 = arith.constant 0 : index
      %105 = vector.load %arg9[%c0_40, %c0_41] : memref<1x128xf32, #tpu.memory_space<vmem>>, vector<1x128xf32>
      %106 = arith.mulf %100, %100 : vector<8x128xf32>
      %cst_42 = arith.constant dense<0.000000e+00> : vector<8xf32>
      %107 = vector.multi_reduction <add>, %106, %cst_42 [1] : vector<8x128xf32> to vector<8xf32>
      %108 = vector.shape_cast %107 : vector<8xf32> to vector<8x1xf32>
      %cst_43 = arith.constant 1.280000e+02 : f32
      %109 = vector.broadcast %cst_43 : f32 to vector<8x1xf32>
      %110 = arith.divf %108, %109 : vector<8x1xf32>
      %cst_44 = arith.constant 9.99999997E-7 : f32
      %111 = vector.broadcast %cst_44 : f32 to vector<8x1xf32>
      %112 = arith.addf %110, %111 : vector<8x1xf32>
      %113 = math.rsqrt %112 : vector<8x1xf32>
      %114 = vector.broadcast %113 : vector<8x1xf32> to vector<8x128xf32>
      %115 = arith.mulf %100, %114 : vector<8x128xf32>
      %116 = vector.broadcast %105 : vector<1x128xf32> to vector<8x128xf32>
      %117 = arith.mulf %115, %116 : vector<8x128xf32>
      %c0_45 = arith.constant 0 : index
      %c0_46 = arith.constant 0 : index
      %c0_47 = arith.constant 0 : index
      %118 = vector.load %arg10[%c0_45, %c0_46, %c0_47] : memref<1x8x128xf32, #tpu.memory_space<vmem>>, vector<1x8x128xf32>
      %119 = vector.shape_cast %118 : vector<1x8x128xf32> to vector<8x128xf32>
      %120 = vector.shape_cast %117 : vector<8x128xf32> to vector<1x8x128xf32>
      tpu.vector_store %arg10[%c0_45, %c0_46, %c0_47], %120 {strides = array<i32>} : memref<1x8x128xf32, #tpu.memory_space<vmem>>, vector<1x8x128xf32>,
    } else {
    }
    return
  }
  func.func @transform_0(%arg0: i32, %arg1: i32) -> (i32, i32, i32) {
    %c0_i32 = arith.constant 0 : i32
    %c0_i32_0 = arith.constant 0 : i32
    %c0_i32_1 = arith.constant 0 : i32
    return %arg0, %c0_i32, %c0_i32_0 : i32, i32, i32
  }
  func.func @transform_1(%arg0: i32, %arg1: i32) -> (i32, i32, i32) {
    %c0_i32 = arith.constant 0 : i32
    %c0_i32_0 = arith.constant 0 : i32
    %c0_i32_1 = arith.constant 0 : i32
    return %arg1, %c0_i32, %c0_i32_0 : i32, i32, i32
  }
  func.func @transform_2(%arg0: i32, %arg1: i32) -> (i32, i32, i32) {
    %c0_i32 = arith.constant 0 : i32
    %c0_i32_0 = arith.constant 0 : i32
    %c0_i32_1 = arith.constant 0 : i32
    return %arg1, %c0_i32, %c0_i32_0 : i32, i32, i32
  }
  func.func @transform_3(%arg0: i32, %arg1: i32) -> (i32, i32, i32, i32) {
    %c0_i32 = arith.constant 0 : i32
    %c0_i32_0 = arith.constant 0 : i32
    %c0_i32_1 = arith.constant 0 : i32
    %c0_i32_2 = arith.constant 0 : i32
    return %arg1, %c0_i32, %c0_i32_0, %c0_i32_1 : i32, i32, i32, i32
  }
  func.func @transform_4(%arg0: i32, %arg1: i32) -> (i32, i32, i32) {
    %c0_i32 = arith.constant 0 : i32
    %c0_i32_0 = arith.constant 0 : i32
    %c0_i32_1 = arith.constant 0 : i32
    return %arg1, %c0_i32, %c0_i32_0 : i32, i32, i32
  }
  func.func @transform_5(%arg0: i32, %arg1: i32) -> (i32, i32, i32) {
    %c0_i32 = arith.constant 0 : i32
    %c0_i32_0 = arith.constant 0 : i32
    %c0_i32_1 = arith.constant 0 : i32
    return %arg1, %c0_i32, %c0_i32_0 : i32, i32, i32
  }
  func.func @transform_6(%arg0: i32, %arg1: i32) -> (i32, i32, i32) {
    %c0_i32 = arith.constant 0 : i32
    %c0_i32_0 = arith.constant 0 : i32
    %c0_i32_1 = arith.constant 0 : i32
    return %arg1, %c0_i32, %c0_i32_0 : i32, i32, i32
  }
  func.func @transform_7(%arg0: i32, %arg1: i32) -> (i32, i32) {
    %c0_i32 = arith.constant 0 : i32
    %c0_i32_0 = arith.constant 0 : i32
    %c0_i32_1 = arith.constant 0 : i32
    return %c0_i32, %c0_i32_0 : i32, i32
  }
  func.func @transform_8(%arg0: i32, %arg1: i32) -> (i32, i32, i32) {
    %c0_i32 = arith.constant 0 : i32
    %c0_i32_0 = arith.constant 0 : i32
    %c0_i32_1 = arith.constant 0 : i32
    return %arg0, %c0_i32, %c0_i32_0 : i32, i32, i32
  }
}

</mosaic_0001>

<bundles_post_ra>
// kernel: tpu_custom_call.1
= control target key start
LH: loop header
LB: loop body
LE: loop exit
PB: predicated region body
PF: predicated region fallthrough
CT: control target
= control target key end

     0   :  { %s4445_s0 = inlined_call_operand.hbm [shape: f32[2,8,128], index: 0, kind: input, shape index: {}]   ;;  %s4446_s1 = inlined_call_operand.hbm [shape: f32[2,1,128], index: 1, kind: input, shape index: {}]   ;;  %s4447_s2 = inlined_call_operand.hbm [shape: bf16[2,128,256], index: 2, kind: input, shape index: {}]   ;;  %s4448_s3 = inlined_call_operand.hbm [shape: bf16[2,4,32,128], index: 3, kind: input, shape index: {}]   ;;  %s4449_s4 = inlined_call_operand.hbm [shape: f32[2,1,128], index: 4, kind: input, shape index: {}]   ;;  %s4450_s5 = inlined_call_operand.hbm [shape: bf16[2,128,896], index: 5, kind: input, shape index: {}]   ;;  %s4451_s6 = inlined_call_operand.hbm [shape: bf16[2,448,128], index: 6, kind: input, shape index: {}]   ;;  %s4452_s7 = inlined_call_operand.hbm [shape: f32[1,128], index: 7, kind: input, shape index: {}]   ;;  %s4453_s8 = inlined_call_operand.hbm [shape: f32[2,8,128], index: 8, kind: output, shape index: {}]  }
   0x1   :  { %4485 = sst [smem:[#allocation34_spill]] %s4445_s0 }
   0x2   :  { %4486 = sst [smem:[#allocation35_spill]] %s4446_s1 }
   0x3   :  { %4487 = sst [smem:[#allocation36_spill]] %s4447_s2 }
   0x4   :  { %4488 = sst [smem:[#allocation37_spill]] %s4448_s3 }
   0x5   :  { %4489 = sst [smem:[#allocation38_spill]] %s4449_s4 }
   0x6   :  { %4490 = sst [smem:[#allocation39_spill]] %s4450_s5 }
   0x7   :  { %4491 = sst [smem:[#allocation40_spill]] %s4451_s6 }
   0x8   :  { %4492 = sst [smem:[#allocation41_spill]] %s4452_s7 }
   0x9   :  { %4493 = sst [smem:[#allocation42_spill]] %s4453_s8 }
   0xa   :  { %13 = vsyncpa [#allocation4], 0 }
   0xb   :  { %15 = vsyncpa [#allocation4 + $0x1], 0 }
   0xc   :  { %16 = vsyncpa [#allocation7], 0 }
   0xd   :  { %18 = vsyncpa [#allocation7 + $0x1], 0 }
   0xe   :  { %19 = vsyncpa [#allocation10], 0 }
   0xf   :  { %21 = vsyncpa [#allocation10 + $0x1], 0 }
  0x10   :  { %22 = vsyncpa [#allocation13], 0 }
  0x11   :  { %24 = vsyncpa [#allocation13 + $0x1], 0 }
  0x12   :  { %25 = vsyncpa [#allocation16], 0 }
  0x13   :  { %26 = vsyncpa [#allocation5], 0 }
  0x14   :  { %28 = vsyncpa [#allocation5 + $0x1], 0  ;;  %s3653_s27 = smov 0   ;;  %s3655_s28 = smov 0  }
  0x15   :  { %s3657_s29 = smov 0   ;;  %s3659_s30 = smov 0  }
  0x16   :  { %s3661_s9 = smov 0   ;;  %s3663_s10 = smov 0  }
  0x17   :  { %s3665_s11 = smov 0   ;;  %s3667_s12 = smov 0  }
  0x18   :  { %s3669_s13 = smov 0   ;;  %s3671_s14 = smov 0  }
  0x19   :  { %s3673_s15 = smov 0  }
  0x1a LB: > { %4494 = sst [smem:[#allocation24_spill]] %s3557_s30  ;;  %p4458_p0 = scmp.eq.s32.totalorder %s3585_s15, 0  ;;  %s3585_s15 = sphi %s3673_s15, %s34_s15   ;;  %s3581_s14 = sphi %s3671_s14, %s4558_s14   ;;  %s3577_s13 = sphi %s3669_s13, %s4566_s13   ;;  %s3573_s12 = sphi %s3667_s12, %s4556_s12   ;;  %s3569_s11 = sphi %s3665_s11, %s4565_s11   ;;  %s3565_s10 = sphi %s3663_s10, %s4564_s10   ;;  %s3561_s9 = sphi %s3661_s9, %s4563_s9   ;;  %s3557_s30 = sphi %s3659_s30, %s4562_s30   ;;  %s3553_s29 = sphi %s3657_s29, %s4561_s29   ;;  %s3549_s28 = sphi %s3655_s28, %s4560_s28   ;;  %s3545_s27 = sphi %s3653_s27, %s4559_s27  }
  0x1b   : > { %4495 = sst [smem:[#allocation25_spill]] %s3569_s11  ;;  %p86_p1 = scmp.ne.s32.totalorder %s3553_s29, %s3549_s28 }
  0x1c   : > { %4496 = sst [smem:[#allocation26_spill]] %s3573_s12  ;;  %p4457_p2 = scmp.lt.s32.totalorder %s3585_s15, 4 }
  0x1d   : > { %4497 = sst [smem:[#allocation27_spill]] %s3581_s14  ;;  %s3714_s17 = sand.u32 1, %s3585_s15  }
  0x1e   : > { %p88_p3 = por %p86_p1, %p4458_p0  ;;  %s3719_s18 = sand.u32 1, %s3553_s29  }
  0x1f   : > { %s2559_s19 = sshll.u32 %s3577_s13, 4  ;;  %s4498_s1 = sld [smem:[#allocation35_spill]] }
  0x20   : > { %s325_s23 = scalar_lea.vmem [#allocation6], %s3719_s18  ;;  %p3730_p4 = pnand %p4457_p2, %p88_p3 }
  0x21   : > { %s332_s24 = sshll.u32 %s325_s23, 4  ;;  %s4500_s4 = sld [smem:[#allocation38_spill]]  ;;  %s3734_s24 = int_to_ptr.vmem [resolvable:$true] %s332_s24 }
  0x22   : > { %s4499_s25 = scalar_select %p3730_p4, 1, 0 }
  0x23   : > { %s4460_s21 = scalar_lea.sflag [#allocation7], %s3714_s17  ;;  %p3746_p6 = pneg %p3730_p4 }
  0x25   : > { %s3725_s22 = scalar_lea.hbm %s4498_s1, %s2559_s19  ;;  %s3214_s6 = scalar_lea.hbm %s4498_s1, 32 }
  0x26   : > { %s3209_s8 = scalar_lea.hbm %s3725_s22, 16  ;;  %p3215_p9 = scmp.lt.u32.totalorder %s3725_s22, %s4498_s1 }
  0x27   : > { %s3739_s20 = scalar_lea.hbm %s4500_s4, %s2559_s19  ;;  %p3210_p5 = scmp.ne.s32.totalorder %s3725_s22, %s3209_s8 }
  0x28   : > { %s4501_s12 = scalar_select %p3746_p6, 1, 0 }
  0x29   : > { %p3212_p7 = pnand %p3746_p6, %p3210_p5  ;;  %p3216_p10 = scmp.lt.u32.totalorder %s3214_s6, %s3209_s8 }
  0x2a   : > { %p3218_p12 = scmp.lt.u32.totalorder %s3209_s8, %s3725_s22 }
  0x2b   : > { %p3213_p8 = pneg %p3212_p7  ;;  %p3217_p11 = por %p3216_p10, %p3215_p9 }
  0x2d   : > { %p3219_p13 = por %p3218_p12, %p3217_p11 }
  0x2f   : > { %p3220_p1 = pnand %p3219_p13, %p3213_p8 }
  0x31   : > { %3223 = shalt.err (!%p3220_p1)
}
  0x32   : > { %s3224_s19 = scalar_lea.vmem %s3734_s24, 16  ;;  %s3587_s11 = smov [#allocation6]  }
  0x33   : > { %p3225_p3 = scmp.ne.s32.totalorder %s3734_s24, %s3224_s19  ;;  %s3229_s26 = sshll.u32 %s3587_s11, 4  ;;  %s3230_s26 = int_to_ptr.vmem [resolvable:$false] %s3229_s26 }
  0x34   : > { %s3231_s2 = scalar_lea.vmem %s3230_s26, 32  ;;  %p3232_p2 = scmp.lt.s32.totalorder %s3734_s24, %s3230_s26 }
  0x35   : > { %p3227_p5 = pnand %p3225_p3, %p3746_p6  ;;  %p3233_p0 = scmp.lt.s32.totalorder %s3231_s2, %s3224_s19 }
  0x37   : > { %p3228_p7 = pneg %p3227_p5  ;;  %p3234_p9 = por %p3233_p0, %p3232_p2 }
  0x39   : > { %p3235_p10 = pnand %p3234_p9, %p3228_p7 }
  0x3b   : > { %3238 = shalt.err (!%p3235_p10)
}
  0x3c   : > { %2906 = dma.hbm_to_vmem [thread:$0]  (!%p3730_p4), %s3725_s22, 16, %s3734_s24, %s4460_s21  }
  0x3d   : > { %s2563_s6 = sshll.u32 %s3719_s18, 6  ;;  %s2710_s8 = sshll.u32 %s3577_s13, 10 }
  0x3e   : > { %s4502_s3 = sld [smem:[#allocation37_spill]]  ;;  %s364_s11 = scalar_lea.vmem [#allocation9], %s2563_s6 }
  0x3f   : > { %s371_s26 = sshll.u32 %s364_s11, 4  ;;  %s2870_s2 = smul.u32 448, %s3719_s18  ;;  %s3778_s26 = int_to_ptr.vmem [resolvable:$true] %s371_s26 }
  0x40   : > { %s4464_s1 = scalar_lea.sflag [#allocation10], %s3714_s17 }
  0x44   : > { %s3776_s19 = scalar_lea.hbm %s4502_s3, %s2710_s8  ;;  %s3244_s8 = scalar_lea.hbm %s4502_s3, 2048 }
  0x45   : > { %s3239_s4 = scalar_lea.hbm %s3776_s19, 1024  ;;  %p3245_p11 = scmp.lt.u32.totalorder %s3776_s19, %s4502_s3 }
  0x46   : > { %p3240_p0 = scmp.ne.s32.totalorder %s3776_s19, %s3239_s4  ;;  %p3246_p12 = scmp.lt.u32.totalorder %s3244_s8, %s3239_s4 }
  0x47   : > { %p3248_p1 = scmp.lt.u32.totalorder %s3239_s4, %s3776_s19 }
  0x48   : > { %p3242_p2 = pnand %p3240_p0, %p3746_p6  ;;  %p3247_p13 = por %p3246_p12, %p3245_p11 }
  0x4a   : > { %p3243_p8 = pneg %p3242_p2  ;;  %p3249_p3 = por %p3248_p1, %p3247_p13 }
  0x4c   : > { %p3250_p5 = pnand %p3249_p3, %p3243_p8 }
  0x4e   : > { %3253 = shalt.err (!%p3250_p5)
}
  0x4f   : > { %s3254_s6 = scalar_lea.vmem %s3778_s26, 1024  ;;  %s3588_s11 = smov [#allocation9]  }
  0x50   : > { %p3255_p7 = scmp.ne.s32.totalorder %s3778_s26, %s3254_s6  ;;  %s3259_s22 = sshll.u32 %s3588_s11, 4  ;;  %s3260_s22 = int_to_ptr.vmem [resolvable:$false] %s3259_s22 }
  0x51   : > { %s3261_s24 = scalar_lea.vmem %s3260_s22, 2048  ;;  %p3262_p0 = scmp.lt.s32.totalorder %s3778_s26, %s3260_s22 }
  0x52   : > { %p3257_p9 = pnand %p3255_p7, %p3746_p6  ;;  %p3263_p2 = scmp.lt.s32.totalorder %s3261_s24, %s3254_s6 }
  0x54   : > { %p3258_p10 = pneg %p3257_p9  ;;  %p3264_p11 = por %p3263_p2, %p3262_p0 }
  0x56   : > { %p3265_p12 = pnand %p3264_p11, %p3258_p10 }
  0x58   : > { %3268 = shalt.err (!%p3265_p12)
}
  0x59   : > { %s4462_s4 = smov 64   ;;  %s4463_s8 = smov 4  }
  0x5a   : > { %2912 = dma.hbm_to_vmem [thread:$0]  (!%p3730_p4), %s3776_s19, 1024, %s3778_s26, %s4464_s1, %s4462_s4, %s4462_s4, %s4463_s8  }
  0x5b   : > { %s2871_s23 = smul.u32 7168, %s3577_s13  ;;  %s402_s16 = scalar_lea.vmem [#allocation12], %s2870_s2 }
  0x5c   : > { %s409_s6 = sshll.u32 %s402_s16, 4  ;;  %s4503_s5 = sld [smem:[#allocation39_spill]]  ;;  %s3816_s6 = int_to_ptr.vmem [resolvable:$true] %s409_s6 }
  0x5d   : > { %s4461_s21 = scalar_lea.sflag [#allocation13], %s3714_s17 }
  0x62   : > { %s3814_s24 = scalar_lea.hbm %s4503_s5, %s2871_s23  ;;  %s3274_s2 = scalar_lea.hbm %s4503_s5, 14336 }
  0x63   : > { %s3269_s3 = scalar_lea.hbm %s3814_s24, 7168  ;;  %p3275_p3 = scmp.lt.u32.totalorder %s3814_s24, %s4503_s5 }
  0x64   : > { %p3270_p8 = scmp.ne.s32.totalorder %s3814_s24, %s3269_s3  ;;  %p3276_p5 = scmp.lt.u32.totalorder %s3274_s2, %s3269_s3 }
  0x65   : > { %p3278_p9 = scmp.lt.u32.totalorder %s3269_s3, %s3814_s24 }
  0x66   : > { %p3272_p13 = pnand %p3270_p8, %p3746_p6  ;;  %p3277_p7 = por %p3276_p5, %p3275_p3 }
  0x68   : > { %p3273_p1 = pneg %p3272_p13  ;;  %p3279_p10 = por %p3278_p9, %p3277_p7 }
  0x6a   : > { %p3280_p0 = pnand %p3279_p10, %p3273_p1 }
  0x6c   : > { %3283 = shalt.err (!%p3280_p0)
}
  0x6d   : > { %s3284_s23 = scalar_lea.vmem %s3816_s6, 7168  ;;  %s3591_s22 = smov [#allocation12]  }
  0x6e   : > { %p3285_p2 = scmp.ne.s32.totalorder %s3816_s6, %s3284_s23  ;;  %s3289_s19 = sshll.u32 %s3591_s22, 4  ;;  %s3290_s19 = int_to_ptr.vmem [resolvable:$false] %s3289_s19 }
  0x6f   : > { %s3291_s26 = scalar_lea.vmem %s3290_s19, 14336  ;;  %p3292_p8 = scmp.lt.s32.totalorder %s3816_s6, %s3290_s19 }
  0x70   : > { %p3287_p11 = pnand %p3285_p2, %p3746_p6  ;;  %p3293_p13 = scmp.lt.s32.totalorder %s3291_s26, %s3284_s23 }
  0x72   : > { %p3288_p12 = pneg %p3287_p11  ;;  %p3294_p3 = por %p3293_p13, %p3292_p8 }
  0x74   : > { %p3295_p5 = pnand %p3294_p3, %p3288_p12 }
  0x76   : > { %3298 = shalt.err (!%p3295_p5)
}
  0x77   : > { %s3592_s3 = smov 448   ;;  %s3593_s2 = smov 28  }
  0x78   : > { %2918 = dma.hbm_to_vmem [thread:$0]  (!%p3730_p4), %s3814_s24, 7168, %s3816_s6, %s4461_s21, %s3592_s3, %s3592_s3, %s3593_s2  }
  0x79   : > { %s3843_s16 = sadd.s32 4294967295, %s3585_s15   ;;  %s2553_s11 = sadd.s32 4294967294, %s3585_s15  }
  0x7a   : > { %p66_p1 = scmp.ne.s32.totalorder %s3561_s9, %s3557_s30  ;;  %p4465_p7 = scmp.eq.s32.totalorder %s3843_s16, 0 }
  0x7b   : > { %p92_p9 = scmp.ne.s32.totalorder %s3549_s28, %s3545_s27  ;;  %p273_p0 = scmp.eq.s32.totalorder %s2553_s11, 3 }
  0x7c   : > { %p3854_p2 = por %p4465_p7, %p66_p1  ;;  %p2554_p8 = scmp.ge.s32.totalorder %s3585_s15, 1 }
  0x7d   : > { %p3860_p11 = por %p92_p9, %p4465_p7  ;;  %p3864_p12 = por %p273_p0, %p66_p1 }
  0x7e   : > { %s4504_s6 = scalar_select %p3854_p2, 1, 0 }
  0x7f   : > { %s4505_s24 = scalar_select %p3860_p11, 1, 0 }
  0x80   : > { %s4507_s23 = scalar_select %p3864_p12, 1, 0 }
  0x81   : > { %4506 = sst [smem:[#allocation28_spill]] %s4505_s24  ;;  %p280_p13 = scmp.lt.s32.totalorder %s3585_s15, 5 }
  0x82   : > { %4508 = sst [smem:[#allocation29_spill]] %s4507_s23  ;;  %s3594_s22 = smov [#allocation15]  }
  0x83   : > { %p3870_p3 = pnand %p2554_p8, %p280_p13  ;;  %s293_s19 = sshll.u32 %s3594_s22, 4  ;;  %s294_s19 = int_to_ptr.vmem [resolvable:$true] %s293_s19 }
  0x84   : > { %s43_s26 = sadd.s32 1, %s3577_s13  ;;  %s46_s11 = sadd.s32 1, %s3581_s14 }
  0x85   : > { %s4509_s27 = scalar_select %p3870_p3, 1, 0 }
  0x86   : > { %p2896_p5 = pneg %p3870_p3  ;;  %p3883_p1 = scmp.ge.s32.totalorder %s43_s26, 2 }
  0x87   : > { %s4512_s7 = sld [smem:[#allocation41_spill]] }
  0x88   : > { %p3879_p9 = pnand %p2896_p5, %p4465_p7 }
  0x89   : > { %s4511_s2 = scalar_select %p3883_p1, 1, 0 }
  0x8a   : > { %p3301_p13 = pneg %p3879_p9 }
  0x8d   : > { %s3299_s22 = scalar_lea.hbm %s4512_s7, 16 }
  0x8e   : > { %p3300_p8 = scmp.ne.s32.totalorder %s4512_s7, %s3299_s22  ;;  %p3306_p10 = scmp.lt.u32.totalorder %s3299_s22, %s4512_s7 }
  0x90   : > { %p3302_p5 = pnand %p3301_p13, %p3300_p8 }
  0x92   : > { %p3303_p7 = pneg %p3302_p5 }
  0x94   : > { %p3308_p12 = pnand %p3306_p10, %p3303_p7 }
  0x96   : > { %3311 = shalt.err (!%p3308_p12)
}
  0x97   : > { %s3312_s21 = scalar_lea.vmem %s294_s19, 16  ;;  %s3319_s4 = scalar_lea.vmem %s294_s19, 32 }
  0x98   : > { %p3313_p0 = scmp.ne.s32.totalorder %s294_s19, %s3312_s21  ;;  %p3320_p3 = scmp.lt.s32.totalorder %s294_s19, %s294_s19 }
  0x99   : > { %p3321_p4 = scmp.lt.s32.totalorder %s3319_s4, %s3312_s21 }
  0x9a   : > { %p3315_p11 = pnand %p3313_p0, %p3301_p13 }
  0x9b   : > { %p3322_p6 = por %p3321_p4, %p3320_p3 }
  0x9c   : > { %p3316_p2 = pneg %p3315_p11 }
  0x9e   : > { %p3323_p1 = pnand %p3322_p6, %p3316_p2 }
  0xa0   : > { %3326 = shalt.err (!%p3323_p1)
}
  0xa1   : > { %2899 = dma.hbm_to_vmem [thread:$0]  (!%p3879_p9), %s4512_s7, 16, %s294_s19, [#allocation16]  }
  0xa2   : > { %p4513_p4 = scmp.ne.s32.totalorder %s4511_s2, 0  ;;  %p4515_p6 = scmp.ne.s32.totalorder %s3565_s10, %s3561_s9 }
  0xa3   : > { %p4516_p7 = scmp.eq.s32.totalorder %s3585_s15, 0  ;;  %p4519_p3 = scmp.eq.s32.totalorder %s3843_s16, 3 }
  0xa4   : > { %s4568_s26 = smov (%p4513_p4, %s43_s26), 0  ;;  %s4570_s11 = smov (!%p4513_p4, %s46_s11), %s3581_s14 }
  0xa5   : > { %4514 = sst [smem:[#allocation30_spill]] %s4568_s26  ;;  %p3919_p10 = por %p4516_p7, %p4515_p6 }
  0xa6   : > { %s76_s21 = ssub.s32 %s3577_s13, %s4568_s26  ;;  %p48_p2 = scmp.ge.s32.totalorder %s4570_s11, 2 }
  0xa7   : > { %p77_p11 = scmp.eq.s32.totalorder %s76_s21, 0  ;;  %p4518_p12 = pmov %p4515_p6 }
  0xa8   : > { %s304_s23 = sand.u32 1, %s3565_s10   ;;  %s4572_s11 = smov (%p48_p2, %s4570_s11), 0 }
  0xa9   : > { %p3930_p9 = por %p4519_p3, %p4518_p12  ;;  %4522 = sst [smem:[#allocation32_spill]] %s4572_s11 }
  0xaa   : > { %s4523_s19 = sadd.s32 1, %s3553_s29  ;;  %s50_s2 = ssub.s32 %s3581_s14, %s4572_s11 }
  0xab   : > { %s4520_s8 = scalar_select %p3930_p9, 1, 0 }
  0xac   : > { %s3940_s3 = scalar_select %p77_p11, %s3553_s29, %s4523_s19  }
  0xad   : > { %4521 = sst [smem:[#allocation31_spill]] %s4520_s8  ;;  %p51_p1 = scmp.eq.s32.totalorder %s50_s2, 0 }
  0xae   : > { %s2557_s22 = sshll.u32 %s304_s23, 3  ;;  %s2558_s4 = sshll.u32 %s3581_s14, 7 }
  0xaf   : > { %s4524_s1 = sadd.s32 1, %s3565_s10  ;;  %s4526_s0 = sld [smem:[#allocation34_spill]] }
  0xb0   : > { %s3948_s5 = scalar_select %p51_p1, %s3565_s10, %s4524_s1  }
  0xb1   : > { %s308_s8 = scalar_lea.vmem [#allocation3], %s2557_s22  ;;  %p4527_p0 = scmp.lt.s32.totalorder %s3585_s15, 4 }
  0xb2   : > { %4525 = sst [smem:[#allocation33_spill]] %s3948_s5  ;;  %s315_s24 = sshll.u32 %s308_s8, 4  ;;  %s3955_s24 = int_to_ptr.vmem [resolvable:$true] %s315_s24 }
  0xb3   : > { %p3961_p8 = pnand %p4527_p0, %p3919_p10  ;;  %s2560_s2 = sshll.u32 %s3719_s18, 7 }
  0xb4   : > { %s2709_s7 = sshll.u32 %s3577_s13, 11 }
  0xb5   : > { %s3953_s26 = scalar_lea.hbm %s4526_s0, %s2558_s4  ;;  %s305_s4 = scalar_lea.sflag [#allocation4], %s304_s23 }
  0xb6   : > { %s3327_s1 = scalar_lea.hbm %s3953_s26, 128  ;;  %p3329_p5 = pneg %p3961_p8 }
  0xb7   : > { %p3328_p13 = scmp.ne.s32.totalorder %s3953_s26, %s3327_s1  ;;  %s3332_s22 = scalar_lea.hbm %s4526_s0, 256 }
  0xb8   : > { %p3333_p7 = scmp.lt.u32.totalorder %s3953_s26, %s4526_s0  ;;  %p3334_p10 = scmp.lt.u32.totalorder %s3332_s22, %s3327_s1 }
  0xb9   : > { %p3330_p4 = pnand %p3329_p5, %p3328_p13  ;;  %p3336_p11 = scmp.lt.u32.totalorder %s3327_s1, %s3953_s26 }
  0xba   : > { %p3335_p2 = por %p3334_p10, %p3333_p7 }
  0xbb   : > { %p3331_p6 = pneg %p3330_p4 }
  0xbc   : > { %p3337_p12 = por %p3336_p11, %p3335_p2 }
  0xbe   : > { %p3338_p3 = pnand %p3337_p12, %p3331_p6 }
  0xc0   : > { %3341 = shalt.err (!%p3338_p3)
}
  0xc1   : > { %s3342_s23 = scalar_lea.vmem %s3955_s24, 128  ;;  %s3595_s8 = smov [#allocation3]  }
  0xc2   : > { %p3343_p1 = scmp.ne.s32.totalorder %s3955_s24, %s3342_s23  ;;  %s3347_s30 = sshll.u32 %s3595_s8, 4  ;;  %s3348_s30 = int_to_ptr.vmem [resolvable:$false] %s3347_s30 }
  0xc3   : > { %s3349_s11 = scalar_lea.vmem %s3348_s30, 256  ;;  %p3350_p4 = scmp.lt.s32.totalorder %s3955_s24, %s3348_s30 }
  0xc4   : > { %p3345_p0 = pnand %p3343_p1, %p3329_p5  ;;  %p3351_p7 = scmp.lt.s32.totalorder %s3349_s11, %s3342_s23 }
  0xc6   : > { %p3346_p13 = pneg %p3345_p0  ;;  %p3352_p10 = por %p3351_p7, %p3350_p4 }
  0xc8   : > { %p3353_p2 = pnand %p3352_p10, %p3346_p13 }
  0xca   : > { %3356 = shalt.err (!%p3353_p2)
}
  0xcb   : > { %2903 = dma.hbm_to_vmem [thread:$0]  (!%p3961_p8), %s3953_s26, 128, %s3955_s24, %s305_s4  }
  0xcc   : > { %s4529_s21 = sld [smem:[#allocation36_spill]]  ;;  %s343_s23 = scalar_lea.vmem [#allocation8], %s2560_s2 }
  0xcd   : > { %s350_s30 = sshll.u32 %s343_s23, 4  ;;  %p4530_p6 = scmp.ne.s32.totalorder %s4501_s12, 0  ;;  %s4001_s30 = int_to_ptr.vmem [resolvable:$true] %s350_s30 }
  0xd2   : > { %s3997_s8 = scalar_lea.hbm %s4529_s21, %s2709_s7  ;;  %s3362_s4 = scalar_lea.hbm %s4529_s21, 4096 }
  0xd3   : > { %s3357_s19 = scalar_lea.hbm %s3997_s8, 2048  ;;  %p3363_p12 = scmp.lt.u32.totalorder %s3997_s8, %s4529_s21 }
  0xd4   : > { %p3358_p5 = scmp.ne.s32.totalorder %s3997_s8, %s3357_s19  ;;  %p3364_p3 = scmp.lt.u32.totalorder %s3362_s4, %s3357_s19 }
  0xd5   : > { %p3366_p0 = scmp.lt.u32.totalorder %s3357_s19, %s3997_s8 }
  0xd6   : > { %p3360_p11 = pnand %p3358_p5, %p4530_p6  ;;  %p3365_p1 = por %p3364_p3, %p3363_p12 }
  0xd8   : > { %p3361_p8 = pneg %p3360_p11  ;;  %p3367_p13 = por %p3366_p0, %p3365_p1 }
  0xda   : > { %p3368_p4 = pnand %p3367_p13, %p3361_p8 }
  0xdc   : > { %3371 = shalt.err (!%p3368_p4)
}
  0xdd   : > { %s3372_s2 = scalar_lea.vmem %s4001_s30, 2048  ;;  %s3596_s1 = smov [#allocation8]  }
  0xde   : > { %p3373_p7 = scmp.ne.s32.totalorder %s4001_s30, %s3372_s2  ;;  %s3377_s22 = sshll.u32 %s3596_s1, 4  ;;  %s3378_s22 = int_to_ptr.vmem [resolvable:$false] %s3377_s22 }
  0xdf   : > { %s3379_s23 = scalar_lea.vmem %s3378_s22, 4096  ;;  %p3380_p5 = scmp.lt.s32.totalorder %s4001_s30, %s3378_s22 }
  0xe0   : > { %p3375_p10 = pnand %p3373_p7, %p4530_p6  ;;  %p3381_p11 = scmp.lt.s32.totalorder %s3379_s23, %s3372_s2 }
  0xe2   : > { %p3376_p2 = pneg %p3375_p10  ;;  %p3382_p12 = por %p3381_p11, %p3380_p5 }
  0xe4   : > { %p3383_p3 = pnand %p3382_p12, %p3376_p2 }
  0xe6   : > { %3386 = shalt.err (!%p3383_p3)
}
  0xe7   : > { %s3597_s19 = smov 128   ;;  %s3598_s24 = smov 8  }
  0xe8   : > { %p4531_p8 = scmp.ne.s32.totalorder %s4499_s25, 0  ;;  %s4532_s26 = scalar_lea.sflag [#allocation7], %s3714_s17 }
  0xe9   : > { %s384_s4 = scalar_lea.vmem [#allocation11], %s3719_s18  ;;  %s2872_s11 = smul.u32 224, %s3719_s18 }
  0xea   : > { %2909 = dma.hbm_to_vmem [thread:$0]  (!%p4531_p8), %s3997_s8, 2048, %s4001_s30, %s4532_s26, %s3597_s19, %s3597_s19, %s3598_s24  }
  0xeb   : > { %s391_s7 = sshll.u32 %s384_s4, 4  ;;  %s2873_s2 = smul.u32 3584, %s3577_s13  ;;  %s392_s7 = int_to_ptr.vmem [resolvable:$true] %s391_s7 }
  0xec   : > { %s3387_s1 = scalar_lea.hbm %s3739_s20, 16  ;;  %s4533_s0 = sld [smem:[#allocation38_spill]] }
  0xed   : > { %p3388_p1 = scmp.ne.s32.totalorder %s3739_s20, %s3387_s1  ;;  %p3396_p2 = scmp.lt.u32.totalorder %s3387_s1, %s3739_s20 }
  0xef   : > { %p3390_p0 = pnand %p3388_p1, %p4530_p6 }
  0xf1   : > { %p3391_p13 = pneg %p3390_p0 }
  0xf2   : > { %s3392_s21 = scalar_lea.hbm %s4533_s0, 32  ;;  %p3393_p4 = scmp.lt.u32.totalorder %s3739_s20, %s4533_s0 }
  0xf3   : > { %p3394_p7 = scmp.lt.u32.totalorder %s3392_s21, %s3387_s1 }
  0xf5   : > { %p3395_p10 = por %p3394_p7, %p3393_p4 }
  0xf7   : > { %p3397_p5 = por %p3396_p2, %p3395_p10 }
  0xf9   : > { %p3398_p11 = pnand %p3397_p5, %p3391_p13 }
  0xfb   : > { %3401 = shalt.err (!%p3398_p11)
}
  0xfc   : > { %s3402_s8 = scalar_lea.vmem %s392_s7, 16  ;;  %s3599_s30 = smov [#allocation11]  }
  0xfd   : > { %p3403_p12 = scmp.ne.s32.totalorder %s392_s7, %s3402_s8  ;;  %s3407_s19 = sshll.u32 %s3599_s30, 4  ;;  %s3408_s19 = int_to_ptr.vmem [resolvable:$false] %s3407_s19 }
  0xfe   : > { %s3409_s24 = scalar_lea.vmem %s3408_s19, 32  ;;  %p3410_p0 = scmp.lt.s32.totalorder %s392_s7, %s3408_s19 }
  0xff   : > { %p3405_p3 = pnand %p3403_p12, %p4530_p6  ;;  %p3411_p9 = scmp.lt.s32.totalorder %s3409_s24, %s3402_s8 }
 0x101   : > { %p3406_p1 = pneg %p3405_p3  ;;  %p3412_p8 = por %p3411_p9, %p3410_p0 }
 0x103   : > { %p3413_p4 = pnand %p3412_p8, %p3406_p1 }
 0x105   : > { %3416 = shalt.err (!%p3413_p4)
}
 0x106   : > { %p4534_p7 = scmp.ne.s32.totalorder %s4499_s25, 0  ;;  %s4535_s0 = scalar_lea.sflag [#allocation10], %s3714_s17 }
 0x107   : > { %s4536_s21 = sld [smem:[#allocation40_spill]]  ;;  %s423_s4 = scalar_lea.vmem [#allocation14], %s2872_s11 }
 0x108   : > { %2915 = dma.hbm_to_vmem [thread:$0]  (!%p4534_p7), %s3739_s20, 16, %s392_s7, %s4535_s0  }
 0x109   : > { %s430_s1 = sshll.u32 %s423_s4, 4  ;;  %s4055_s1 = int_to_ptr.vmem [resolvable:$true] %s430_s1 }
 0x10d   : > { %s4051_s26 = scalar_lea.hbm %s4536_s21, %s2873_s2  ;;  %s3422_s23 = scalar_lea.hbm %s4536_s21, 7168 }
 0x10e   : > { %s3417_s22 = scalar_lea.hbm %s4051_s26, 3584  ;;  %p3423_p10 = scmp.lt.u32.totalorder %s4051_s26, %s4536_s21 }
 0x10f   : > { %p3418_p9 = scmp.ne.s32.totalorder %s4051_s26, %s3417_s22  ;;  %p3424_p2 = scmp.lt.u32.totalorder %s3422_s23, %s3417_s22 }
 0x110   : > { %p3426_p11 = scmp.lt.u32.totalorder %s3417_s22, %s4051_s26 }
 0x111   : > { %p3420_p8 = pnand %p3418_p9, %p4530_p6  ;;  %p3425_p5 = por %p3424_p2, %p3423_p10 }
 0x113   : > { %p3421_p13 = pneg %p3420_p8  ;;  %p3427_p12 = por %p3426_p11, %p3425_p5 }
 0x115   : > { %p3428_p3 = pnand %p3427_p12, %p3421_p13 }
 0x117   : > { %3431 = shalt.err (!%p3428_p3)
}
 0x118   : > { %s3432_s18 = scalar_lea.vmem %s4055_s1, 3584  ;;  %s3600_s11 = smov [#allocation14]  }
 0x119   : > { %p3433_p1 = scmp.ne.s32.totalorder %s4055_s1, %s3432_s18  ;;  %s3437_s30 = sshll.u32 %s3600_s11, 4  ;;  %s3438_s30 = int_to_ptr.vmem [resolvable:$false] %s3437_s30 }
 0x11a   : > { %s3439_s19 = scalar_lea.vmem %s3438_s30, 7168  ;;  %p3440_p9 = scmp.lt.s32.totalorder %s4055_s1, %s3438_s30 }
 0x11b   : > { %p3435_p0 = pnand %p3433_p1, %p4530_p6  ;;  %p3441_p8 = scmp.lt.s32.totalorder %s3439_s19, %s3432_s18 }
 0x11d   : > { %p3436_p4 = pneg %p3435_p0  ;;  %p3442_p10 = por %p3441_p8, %p3440_p9 }
 0x11f   : > { %p3443_p2 = pnand %p3442_p10, %p3436_p4 }
 0x121   : > { %3446 = shalt.err (!%p3443_p2)
}
 0x122   : > { %s4537_s24 = smov 4   ;;  %s4538_s0 = smov 64  }
 0x123   : > { %s4539_s14 = scalar_lea.sflag [#allocation13], %s3714_s17  ;;  %p4540_p6 = scmp.ne.s32.totalorder %s4509_s27, 0 }
 0x124   : > { %2921 = dma.hbm_to_vmem [thread:$0]  (!%p4534_p7), %s4051_s26, 3584, %s4055_s1, %s4539_s14, %s4538_s0, %s4538_s0, %s4537_s24  }
 0x125   : > { %442 = sbr.rel (%p4540_p6) target bundleno = 2752 (0xac0), region = 52  ;;  %s4086_s12 = sand.u32 (!%p4540_p6), 1, %s3561_s9  }
 0x126   : > { %s2570_s5 = sshll.u32 (!%p4540_p6), %s4086_s12, 3  ;;  %s445_s4 = scalar_lea.sflag (!%p4540_p6), [#allocation4], %s4086_s12 }
 0x127   : > { %s448_s25 = scalar_lea.vmem (!%p4540_p6), [#allocation3], %s2570_s5  ;;  %p4541_p13 = scmp.ne.s32.totalorder (!%p4540_p6), %s4504_s6, 0 }
 0x12c   : > { %3520 = dma.done.wait (%p4541_p13), %s445_s4, 128  }
 0x12d   : > { %3522 = vsyncadd (%p4541_p13), %s445_s4, 4294967168  ;;  %s4542_s17 = sld [smem:[#allocation28_spill]]  ;;  %s453_s26 = sand.u32 1, %s3843_s16  }
 0x12e   : > { %s4096_s27 = sand.u32 1, %s3549_s28   ;;  %s454_s1 = scalar_lea.sflag [#allocation7], %s453_s26 }
 0x12f   : > { %s456_s22 = scalar_lea.vmem [#allocation6], %s4096_s27 }
 0x133   : > { %p4543_p7 = scmp.ne.s32.totalorder %s4542_s17, 0 }
 0x135   : > { %3524 = dma.done.wait (%p4543_p7), %s454_s1, 2064  }
 0x136   : > { %3526 = vsyncadd (%p4543_p7), %s454_s1, 4294965232  ;;  %s2571_s20 = sshll.u32 %s4096_s27, 7  ;;  %s2572_s6 = sshll.u32 %s4096_s27, 6 }
 0x137   : > { %s4105_s7 = scalar_lea.vmem [#allocation8], %s2571_s20  ;;  %s471_s23 = scalar_lea.sflag [#allocation10], %s453_s26 }
 0x138   : > { %s4107_s2 = scalar_lea.vmem [#allocation9], %s2572_s6 }
 0x139   : > { %3528 = dma.done.wait (%p4543_p7), %s471_s23, 1040  }
 0x13a   : > { %3530 = vsyncadd (%p4543_p7), %s471_s23, 4294966256  ;;  %s2874_s8 = smul.u32 448, %s4096_s27  ;;  %s482_s18 = scalar_lea.vmem [#allocation11], %s4096_s27 }
 0x13b   : > { %s488_s11 = scalar_lea.sflag [#allocation13], %s453_s26 }
 0x13c   : > { %s4115_s30 = scalar_lea.vmem [#allocation12], %s2874_s8 }
 0x13d   : > { %3532 = dma.done.wait (%p4543_p7), %s488_s11, 10752  }
 0x13e   : > { %3534 = vsyncadd (%p4543_p7), %s488_s11, 4294956544  ;;  %s2875_s19 = smul.u32 224, %s4096_s27  ;;  %p4544_p5 = scmp.eq.s32.totalorder %s3843_s16, 0 }
 0x140   : > { %s4122_s24 = scalar_lea.vmem [#allocation14], %s2875_s19 }
 0x141   : > { %3536 = dma.done.wait (%p4544_p5), [#allocation16], 16   ;;  %p4545_p11 = pmov %p4544_p5 }
 0x142   : > { %s4128_s0 = scalar_lea.vmem [#allocation17], %s2570_s5  ;;  %s4546_s14 = sld [smem:[#allocation25_spill]] }
 0x143   : > { %3538 = vsyncadd (%p4545_p11), [#allocation16], 4294967280 }
 0x148   : > { %p2575_p12 = scmp.ne.s32.totalorder %s4546_s14, 0 }
 0x149   : > { %v570_v0 = vld [vmem:[%s448_s25] sm:$0xff] (!%p2575_p12) }
 0x14a   : > { %569 = sbr.rel (%p2575_p12) target bundleno = 337 (0x151), region = 88  ;;  %571 = vst [vmem:[#allocation2] sm:$0xff] (!%p2575_p12), %v570_v0 }
 0x151 PF: > { %v4131_v1 = vld [vmem:[#allocation2] sm:$0xff]  ;;  %v3034_v5 = vld [vmem:[%s4105_s7 + $0x14] ss:$8 sps:$4 sm:$0xff]   ;;  %v3036_v6 = vld [vmem:[%s4105_s7 + $0x10] ss:$8 sps:$4 sm:$0xff]   ;;  %v3601_v16 = vmov 0  }
 0x152   : > { %v574_v2 = vmul.f32 %v4131_v1, %v4131_v1  ;;  %v3031_v3 = vld [vmem:[%s4105_s7 + $0x4] ss:$8 sps:$4 sm:$0xff]   ;;  %v3033_v4 = vld [vmem:[%s4105_s7] ss:$8 sps:$4 sm:$0xff]   ;;  %v3040_v9 = vld [vmem:[%s4105_s7 + $0x34] ss:$8 sps:$4 sm:$0xff]   ;;  %718 = vmatprep.mubr.bf16.mxu0 %v3601_v16 }
 0x153   : > { %686 = vmatprep.subr.bf16.mxu0 %v3031_v3  ;;  %v3037_v7 = vld [vmem:[%s4105_s7 + $0x24] ss:$8 sps:$4 sm:$0xff]   ;;  %v3039_v8 = vld [vmem:[%s4105_s7 + $0x20] ss:$8 sps:$4 sm:$0xff]   ;;  %v3042_v10 = vld [vmem:[%s4105_s7 + $0x30] ss:$8 sps:$4 sm:$0xff]  }
 0x154   : > { %575 = vadd.xlane.f32.xlu0 %v574_v2  ;;  %687 = vmatpush1.bf16.msra.mxu0 %v3033_v4  ;;  %v3043_v11 = vld [vmem:[%s4105_s7 + $0x44] ss:$8 sps:$4 sm:$0xff]   ;;  %v3045_v12 = vld [vmem:[%s4105_s7 + $0x40] ss:$8 sps:$4 sm:$0xff]   ;;  %v3046_v13 = vld [vmem:[%s4105_s7 + $0x54] ss:$8 sps:$4 sm:$0xff]  }
 0x155   : > { %688 = vmatprep.subr.bf16.mxu0 %v3034_v5  ;;  %v3048_v14 = vld [vmem:[%s4105_s7 + $0x50] ss:$8 sps:$4 sm:$0xff]   ;;  %v3049_v15 = vld [vmem:[%s4105_s7 + $0x64] ss:$8 sps:$4 sm:$0xff]   ;;  %v3051_v17 = vld [vmem:[%s4105_s7 + $0x60] ss:$8 sps:$4 sm:$0xff]  }
 0x156   : > { %v3052_v18 = vld [vmem:[%s4105_s7 + $0x74] ss:$8 sps:$4 sm:$0xff]   ;;  %v3054_v19 = vld [vmem:[%s4105_s7 + $0x70] ss:$8 sps:$4 sm:$0xff]   ;;  %v2576_v24 = vld [vmem:[%s456_s22] ss:$0 sm:$0xff] }
 0x157   : > { %v3602_v28 = vmov 0.0   ;;  %vm3603_vm0 = vmmov 0   ;;  %s3604_s16 = smov 96   ;;  %vm751_vm1 = vcmask 261120   ;;  %s3605_s5 = smov 64   ;;  %vm930_vm2 = vcmask 64512  }
 0x158   : > { %689 = vmatpush1.bf16.msra.mxu0 %v3036_v6  ;;  %2776 = vmatprep.subr.bf16.mxu1 %v3602_v28  ;;  %s3606_s4 = smov 32   ;;  %vm985_vm3 = vcmask 1043456   ;;  %vm1979_vm4 = vcmask 523264   ;;  %s4547_s25 = sld [smem:[#allocation25_spill]] }
 0x159   : > { %690 = vmatprep.subr.bf16.mxu0 %v3037_v7  ;;  %2778 = vmatprep.mubr.msk.bf16.mxu1 %vm3603_vm0, %v3602_v28 }
 0x15c   : > { %691 = vmatpush1.bf16.msra.mxu0 %v3039_v8 }
 0x15d   : > { %692 = vmatprep.subr.bf16.mxu0 %v3040_v9 }
 0x15e   : > { %p2703_p3 = scmp.ne.s32.totalorder %s4547_s25, 1 }
 0x160   : > { %693 = vmatpush1.bf16.msra.mxu0 %v3042_v10 }
 0x161   : > { %694 = vmatprep.subr.bf16.mxu0 %v3043_v11 }
 0x164   : > { %695 = vmatpush1.bf16.msra.mxu0 %v3045_v12 }
 0x165   : > { %696 = vmatprep.subr.bf16.mxu0 %v3046_v13 }
 0x168   : > { %697 = vmatpush1.bf16.msra.mxu0 %v3048_v14 }
 0x169   : > { %698 = vmatprep.subr.bf16.mxu0 %v3049_v15 }
 0x16c   : > { %699 = vmatpush1.bf16.msra.mxu0 %v3051_v17 }
 0x16d   : > { %700 = vmatprep.subr.bf16.mxu0 %v3052_v18 }
 0x170   : > { %701 = vmatpush1.bf16.msra.mxu0 %v3054_v19 }
 0x171   : > { %2770 = vmatprep.subr.bf16.mxu0 %v3602_v28 }
 0x1e1   : > { %v576_v20 = vpop.xlane.xlu0 %575 }
 0x1e2   : > { %v578_v21 = vmul.f32 0.0078125, %v576_v20 }
 0x1e4   : > { %v579_v22 = vadd.f32 1e-06, %v578_v21 }
 0x1e6   : > { %3171 = vrsqrt.f32 %v579_v22 }
 0x1f0   : > { %v3172_v23 = vpop.eup %3171 }
 0x1f1   : > { %v581_v25 = vmul.f32 %v3172_v23, %v4131_v1 }
 0x1f3   : > { %v588_v26 = vmul.f32 %v2576_v24, %v581_v25 }
 0x1f5   : > { %v589_v27 = vpack.c.bf16 %v588_v26, %v588_v26 }
 0x1f7   : > { %719 = vmatmul.mubr.bf16.vlgmr.msra.gmra.mrb[0].mxu0 %v589_v27 }
 0x1f8   : > { %2772 = vmatprep.mubr.msk.bf16.mxu0 %vm3603_vm0, %v3602_v28 }
 0x2ca   : > { %v720_v29 = vpop.f32.mrb[0].mxu0 }
 0x2cb   : > { %728 = vrot.lane.b32.xlu0 %v720_v29, %s3604_s16  ;;  %v722_v30 = vpop.f32.mrb[1].mxu0  ;;  %v737_v35 = vmul.f32 0.17677669, %v720_v29 }
 0x2cc   : > { %v4161_v31 = vpack.c.bf16 %v722_v30, %v722_v30  ;;  %746 = vrot.lane.b32.xlu1 %v722_v30, %s3604_s16  ;;  %v724_v32 = vpop.f32.mrb[2].mxu0 }
 0x2cd   : > { %v725_v33 = vpop.f32.mrb[3].mxu0  ;;  %v741_v36 = vpack.c.bf16 %v737_v35, %v737_v35 }
 0x2ce   : > { %v756_v34 = vsel %vm751_vm1, %v4161_v31, 0 }
 0x2cf   : > { %2771 = vmatpush3.bf16.xpose.msra.mxu0 %v756_v34  ;;  %2777 = vmatpush3.bf16.xpose.msra.mxu1 %v756_v34 }
 0x2d0   : > { %731 = vrot.lane.b32.xlu1 %v720_v29, %s3605_s5  ;;  %2782 = vmatprep.subr.bf16.mxu1 %v3602_v28 }
 0x2d1   : > { %2794 = vmatprep.subr.bf16.mxu0 %v3602_v28 }
 0x2d4   : > { %734 = vrot.lane.b32.xlu1 %v720_v29, %s3606_s4 }
 0x2d6   : > { %2773 = vmatmul.mubr.msk.bf16.vlgmr.msra.gmra.mrb[4].mxu0 %vm751_vm1, %v741_v36 }
 0x2d7   : > { %2796 = vmatprep.mubr.msk.bf16.mxu0 %vm3603_vm0, %v3602_v28 }
 0x33d   : > { %v729_v37 = vpop.permute.xlu0 %728 }
 0x33e   : > { %v738_v38 = vmul.f32 0.17677669, %v729_v37  ;;  %v747_v39 = vpop.permute.xlu1 %746 }
 0x33f   : > { %v4171_v40 = vpack.c.bf16 %v747_v39, %v747_v39 }
 0x340   : > { %v742_v41 = vpack.c.bf16 %v738_v38, %v738_v38 }
 0x341   : > { %v845_v42 = vsel %vm751_vm1, %v4171_v40, 0 }
 0x342   : > { %v732_v43 = vpop.permute.xlu1 %731  ;;  %2779 = vmatmul.mubr.msk.bf16.vlgmr.msra.gmra.mrb[0].mxu1 %vm751_vm1, %v742_v41 }
 0x343   : > { %2783 = vmatpush3.bf16.xpose.msra.mxu1 %v845_v42  ;;  %2784 = vmatprep.mubr.msk.bf16.mxu1 %vm3603_vm0, %v3602_v28  ;;  %v739_v44 = vmul.f32 0.17677669, %v732_v43 }
 0x344   : > { %2788 = vmatprep.subr.bf16.mxu1 %v3602_v28 }
 0x345   : > { %v743_v45 = vpack.c.bf16 %v739_v44, %v739_v44 }
 0x346   : > { %v735_v46 = vpop.permute.xlu1 %734 }
 0x347   : > { %v740_v47 = vmul.f32 0.17677669, %v735_v46 }
 0x349   : > { %v744_v48 = vpack.c.bf16 %v740_v47, %v740_v47 }
 0x34a   : > { %2785 = vmatmul.mubr.msk.bf16.vlgmr.msra.gmra.mrb[4].mxu1 %vm751_vm1, %v743_v45  ;;  %v3055_v45 = vld [vmem:[%s4107_s2] sm:$0xff]  }
 0x34b   : > { %2789 = vmatpush3.bf16.xpose.msra.mxu1 %v845_v42  ;;  %2790 = vmatprep.mubr.msk.bf16.mxu1 %vm3603_vm0, %v3602_v28 }
 0x34c   : > { %2800 = vmatprep.subr.bf16.mxu1 %v3602_v28 }
 0x352   : > { %2791 = vmatmul.mubr.msk.bf16.vlgmr.msra.gmra.mrb[8].mxu1 %vm751_vm1, %v744_v48  ;;  %v3056_v48 = vld [vmem:[%s4107_s2 + $0x10] sm:$0xff]  }
 0x353   : > { %2802 = vmatprep.mubr.msk.bf16.mxu1 %vm3603_vm0, %v3602_v28 }
 0x3a9   : > { %v792_v49 = vpop.f32.mrb[4].mxu0 }
 0x3aa   : > { %v2774_v50 = vpop.f32.mrb[5].mxu0  ;;  %v931_v51 = vsel %vm930_vm2, %v792_v49, -inf }
 0x3ab   : > { %932 = vmax.xlane.f32.xlu1 %v931_v51  ;;  %v795_v52 = vpop.f32.mrb[6].mxu0  ;;  %v3057_v50 = vld [vmem:[%s4107_s2 + $0x8] sm:$0xff]   ;;  %v3058_v51 = vld [vmem:[%s4107_s2 + $0x18] sm:$0xff]  }
 0x3ac   : > { %v2775_v53 = vpop.f32.mrb[7].mxu0 }
 0x415   : > { %v835_v54 = vpop.f32.mrb[0].mxu1 }
 0x416   : > { %v2780_v55 = vpop.f32.mrb[1].mxu1  ;;  %v934_v56 = vsel %vm930_vm2, %v835_v54, -inf }
 0x417   : > { %935 = vmax.xlane.f32.xlu0 %v934_v56  ;;  %v838_v57 = vpop.f32.mrb[2].mxu1 }
 0x418   : > { %v2781_v58 = vpop.f32.mrb[3].mxu1 }
 0x41d   : > { %v881_v59 = vpop.f32.mrb[4].mxu1 }
 0x41e   : > { %v2786_v60 = vpop.f32.mrb[5].mxu1  ;;  %v937_v61 = vsel %vm930_vm2, %v881_v59, -inf }
 0x41f   : > { %v884_v62 = vpop.f32.mrb[6].mxu1  ;;  %938 = vmax.xlane.f32.xlu1 %v937_v61 }
 0x420   : > { %v2787_v63 = vpop.f32.mrb[7].mxu1 }
 0x425   : > { %v924_v0 = vpop.f32.mrb[8].mxu1 }
 0x426   : > { %v2792_v2 = vpop.f32.mrb[9].mxu1  ;;  %v940_v3 = vsel %vm930_vm2, %v924_v0, -inf }
 0x427   : > { %v927_v4 = vpop.f32.mrb[10].mxu1  ;;  %941 = vmax.xlane.f32.xlu1 %v940_v3  ;;  %v3062_v2 = vld [vmem:[%s4107_s2 + $0x38] sm:$0xff]  }
 0x428   : > { %v2793_v5 = vpop.f32.mrb[11].mxu1 }
 0x438   : > { %v933_v6 = vpop.xlane.xlu1 %932 }
 0x439   : > { %v943_v7 = vsub.f32 %v792_v49, %v933_v6 }
 0x43b   : > { %v947_v8 = vmul.f32 1.442695, %v943_v7 }
 0x43d   : > { %3173 = vpow2.f32 %v947_v8 }
 0x447   : > { %v3174_v9 = vpop.eup %3173 }
 0x448   : > { %v955_v10 = vsel %vm930_vm2, %v3174_v9, 0.0 }
 0x449   : > { %956 = vadd.xlane.f32.xlu1 %v955_v10 }
 0x4a4   : > { %v936_v11 = vpop.xlane.xlu0 %935 }
 0x4a5   : > { %v944_v12 = vsub.f32 %v835_v54, %v936_v11  ;;  %v3059_v54 = vld [vmem:[%s4107_s2 + $0x20] sm:$0xff]  }
 0x4a7   : > { %v949_v13 = vmul.f32 1.442695, %v944_v12 }
 0x4a9   : > { %3175 = vpow2.f32 %v949_v13  ;;  %v3063_v13 = vld [vmem:[%s4115_s30] ss:$28 sps:$4 sm:$0xff]  }
 0x4ac   : > { %v939_v14 = vpop.xlane.xlu1 %938 }
 0x4ad   : > { %v945_v15 = vsub.f32 %v881_v59, %v939_v14  ;;  %v3061_v59 = vld [vmem:[%s4107_s2 + $0x30] sm:$0xff]   ;;  %v3065_v14 = vld [vmem:[%s4115_s30 + $0x4] ss:$28 sps:$4 sm:$0xff]  }
 0x4af   : > { %v951_v17 = vmul.f32 1.442695, %v945_v15  ;;  %v3066_v15 = vld [vmem:[%s4115_s30 + $0x8] ss:$28 sps:$4 sm:$0xff]  }
 0x4b1   : > { %3177 = vpow2.f32 %v951_v17  ;;  %v3068_v17 = vld [vmem:[%s4115_s30 + $0xc] ss:$28 sps:$4 sm:$0xff]  }
 0x4b3   : > { %v3176_v18 = vpop.eup %3175 }
 0x4b4   : > { %v942_v19 = vpop.xlane.xlu1 %941  ;;  %v958_v20 = vsel %vm930_vm2, %v3176_v18, 0.0 }
 0x4b5   : > { %v946_v21 = vsub.f32 %v924_v0, %v942_v19  ;;  %959 = vadd.xlane.f32.xlu0 %v958_v20  ;;  %v3060_v0 = vld [vmem:[%s4107_s2 + $0x28] sm:$0xff]   ;;  %v3069_v20 = vld [vmem:[%s4115_s30 + $0x38] ss:$28 sps:$4 sm:$0xff]  }
 0x4b6   : > { %v3074_v19 = vld [vmem:[%s4115_s30 + $0x44] ss:$28 sps:$4 sm:$0xff]  }
 0x4b7   : > { %v953_v22 = vmul.f32 1.442695, %v946_v21  ;;  %v3072_v21 = vld [vmem:[%s4115_s30 + $0x40] ss:$28 sps:$4 sm:$0xff]  }
 0x4b9   : > { %3179 = vpow2.f32 %v953_v22  ;;  %v3077_v22 = vld [vmem:[%s4115_s30 + $0x74] ss:$28 sps:$4 sm:$0xff]  }
 0x4bb   : > { %v3178_v23 = vpop.eup %3177 }
 0x4bc   : > { %v961_v24 = vsel %vm930_vm2, %v3178_v23, 0.0 }
 0x4bd   : > { %962 = vadd.xlane.f32.xlu1 %v961_v24  ;;  %v3075_v24 = vld [vmem:[%s4115_s30 + $0x70] ss:$28 sps:$4 sm:$0xff]  }
 0x4c3   : > { %v3180_v25 = vpop.eup %3179 }
 0x4c4   : > { %v964_v26 = vsel %vm930_vm2, %v3180_v25, 0.0 }
 0x4c5   : > { %965 = vadd.xlane.f32.xlu0 %v964_v26 }
 0x4ce   : > { %980 = vrot.lane.b32.xlu1 %v4161_v31, %s3605_s5 }
 0x4d6   : > { %v957_v27 = vpop.xlane.xlu1 %956 }
 0x4d7   : > { %3181 = vrcp.f32 %v957_v27 }
 0x4db   : > { %1073 = vrot.lane.b32.xlu0 %v4171_v40, %s3605_s5 }
 0x4e1   : > { %v3182_v30 = vpop.eup %3181 }
 0x4e2   : > { %v971_v34 = vmul.f32 %v3182_v30, %v3174_v9 }
 0x4e4   : > { %v975_v38 = vpack.c.bf16 %v971_v34, %v971_v34 }
 0x542   : > { %v960_v29 = vpop.xlane.xlu0 %959 }
 0x543   : > { %3183 = vrcp.f32 %v960_v29 }
 0x54a   : > { %v963_v32 = vpop.xlane.xlu1 %962 }
 0x54b   : > { %3185 = vrcp.f32 %v963_v32 }
 0x54d   : > { %v3184_v33 = vpop.eup %3183 }
 0x54e   : > { %v972_v35 = vmul.f32 %v3184_v33, %v3176_v18  ;;  %v981_v36 = vpop.permute.xlu1 %980  ;;  %v3071_v18 = vld [vmem:[%s4115_s30 + $0x3c] ss:$28 sps:$4 sm:$0xff]  }
 0x54f   : > { %v987_v37 = vsel %vm985_vm3, %v981_v36, 0 }
 0x550   : > { %2795 = vmatpush3.bf16.msra.mxu0 %v987_v37  ;;  %2801 = vmatpush3.bf16.msra.mxu1 %v987_v37  ;;  %v976_v31 = vpack.c.bf16 %v972_v35, %v972_v35 }
 0x551   : > { %2806 = vmatprep.subr.bf16.mxu0 %v3602_v28  ;;  %2812 = vmatprep.subr.bf16.mxu1 %v3602_v28 }
 0x552   : > { %v966_v39 = vpop.xlane.xlu0 %965 }
 0x553   : > { %3187 = vrcp.f32 %v966_v39  ;;  %2797 = vmatmul.mubr.msk.bf16.vlgmr.msra.gmra.mrb[8].mxu0 %vm930_vm2, %v975_v38  ;;  %2803 = vmatmul.mubr.msk.bf16.vlgmr.msra.gmra.mrb[12].mxu1 %vm930_vm2, %v976_v31 }
 0x554   : > { %2808 = vmatprep.mubr.msk.bf16.mxu0 %vm3603_vm0, %v3602_v28  ;;  %2814 = vmatprep.mubr.msk.bf16.mxu1 %vm3603_vm0, %v3602_v28 }
 0x555   : > { %v3186_v40 = vpop.eup %3185 }
 0x556   : > { %v973_v41 = vmul.f32 %v3186_v40, %v3178_v23  ;;  %v1074_v42 = vpop.permute.xlu0 %1073  ;;  %v3080_v23 = vld [vmem:[%s4115_s30 + $0x7c] ss:$28 sps:$4 sm:$0xff]  }
 0x557   : > { %v1079_v43 = vsel %vm985_vm3, %v1074_v42, 0 }
 0x558   : > { %2807 = vmatpush3.bf16.msra.mxu0 %v1079_v43  ;;  %2813 = vmatpush3.bf16.msra.mxu1 %v1079_v43  ;;  %v977_v44 = vpack.c.bf16 %v973_v41, %v973_v41 }
 0x559   : > { %2818 = vmatprep.subr.bf16.mxu0 %v3602_v28  ;;  %2826 = vmatprep.subr.bf16.mxu1 %v3602_v28 }
 0x55b   : > { %2809 = vmatmul.mubr.msk.bf16.vlgmr.msra.gmra.mrb[12].mxu0 %vm930_vm2, %v977_v44 }
 0x55c   : > { %2819 = vmatpush3.bf16.msra.mxu0 %v3055_v45  ;;  %2822 = vmatprep.mubr.msk.bf16.mxu0 %vm3603_vm0, %v3602_v28 }
 0x55d   : > { %v3188_v46 = vpop.eup %3187  ;;  %2820 = vmatprep.subr.bf16.mxu0 %v3602_v28 }
 0x55e   : > { %v974_v47 = vmul.f32 %v3188_v46, %v3180_v25  ;;  %v3078_v25 = vld [vmem:[%s4115_s30 + $0x78] ss:$28 sps:$4 sm:$0xff]  }
 0x560   : > { %v978_v49 = vpack.c.bf16 %v974_v47, %v974_v47  ;;  %2821 = vmatpush3.bf16.msra.mxu0 %v3057_v50  ;;  %v3081_v50 = vld [vmem:[%s4115_s30 + $0xa8] ss:$28 sps:$4 sm:$0xff]  }
 0x561   : > { %2834 = vmatprep.subr.bf16.mxu0 %v3602_v28 }
 0x562   : > { %2815 = vmatmul.mubr.msk.bf16.vlgmr.msra.gmra.mrb[16].mxu1 %vm930_vm2, %v978_v49  ;;  %v3086_v49 = vld [vmem:[%s4115_s30 + $0xb4] ss:$28 sps:$4 sm:$0xff]  }
 0x563   : > { %2827 = vmatpush3.bf16.msra.mxu1 %v3056_v48  ;;  %2830 = vmatprep.mubr.msk.bf16.mxu1 %vm3603_vm0, %v3602_v28  ;;  %v3083_v48 = vld [vmem:[%s4115_s30 + $0xac] ss:$28 sps:$4 sm:$0xff]  }
 0x564   : > { %2828 = vmatprep.subr.bf16.mxu1 %v3602_v28 }
 0x567   : > { %2829 = vmatpush3.bf16.msra.mxu1 %v3058_v51  ;;  %v3084_v51 = vld [vmem:[%s4115_s30 + $0xb0] ss:$28 sps:$4 sm:$0xff]  }
 0x568   : > { %2842 = vmatprep.subr.bf16.mxu1 %v3602_v28 }
 0x626   : > { %v1023_v52 = vpop.f32.mrb[8].mxu0  ;;  %v1066_v53 = vpop.f32.mrb[12].mxu1 }
 0x627   : > { %v1164_v55 = vpack.c.bf16 %v1023_v52, %v1023_v52  ;;  %v1165_v56 = vpack.c.bf16 %v1066_v53, %v1066_v53  ;;  %v2798_v57 = vpop.f32.mrb[9].mxu0  ;;  %v2804_v58 = vpop.f32.mrb[13].mxu1  ;;  %v3092_v52 = vld [vmem:[%s4115_s30 + $0xec] ss:$28 sps:$4 sm:$0xff]   ;;  %v3087_v53 = vld [vmem:[%s4115_s30 + $0xe0] ss:$28 sps:$4 sm:$0xff]  }
 0x628   : > { %v1026_v60 = vpop.f32.mrb[10].mxu0  ;;  %v1069_v61 = vpop.f32.mrb[14].mxu1  ;;  %v3093_v57 = vld [vmem:[%s4115_s30 + $0x118] ss:$28 sps:$4 sm:$0xff]   ;;  %v3096_v58 = vld [vmem:[%s4115_s30 + $0x120] ss:$28 sps:$4 sm:$0xff]  }
 0x629   : > { %v2799_v62 = vpop.f32.mrb[11].mxu0  ;;  %v2805_v63 = vpop.f32.mrb[15].mxu1  ;;  %2823 = vmatmul.mubr.msk.bf16.vlgmr.msra.gmra.mrb[16].mxu0 %vm751_vm1, %v1164_v55  ;;  %2831 = vmatmul.mubr.msk.bf16.vlgmr.msra.gmra.mrb[20].mxu1 %vm751_vm1, %v1165_v56  ;;  %v3095_v55 = vld [vmem:[%s4115_s30 + $0x11c] ss:$28 sps:$4 sm:$0xff]   ;;  %v3098_v56 = vld [vmem:[%s4115_s30 + $0x124] ss:$28 sps:$4 sm:$0xff]  }
 0x62a   : > { %2835 = vmatpush3.bf16.msra.mxu0 %v3059_v54  ;;  %2838 = vmatprep.mubr.msk.bf16.mxu0 %vm3603_vm0, %v3602_v28  ;;  %v3090_v54 = vld [vmem:[%s4115_s30 + $0xe8] ss:$28 sps:$4 sm:$0xff]   ;;  %v3104_v60 = vld [vmem:[%s4115_s30 + $0x15c] ss:$28 sps:$4 sm:$0xff]   ;;  %v3099_v61 = vld [vmem:[%s4115_s30 + $0x150] ss:$28 sps:$4 sm:$0xff]  }
 0x62b   : > { %2836 = vmatprep.subr.bf16.mxu0 %v3602_v28  ;;  %2843 = vmatpush3.bf16.msra.mxu1 %v3061_v59  ;;  %v3101_v59 = vld [vmem:[%s4115_s30 + $0x154] ss:$28 sps:$4 sm:$0xff]   ;;  %v3107_v63 = vld [vmem:[%s4115_s30 + $0x18c] ss:$28 sps:$4 sm:$0xff]  }
 0x62c   : > { %2844 = vmatprep.subr.bf16.mxu1 %v3602_v28  ;;  %2846 = vmatprep.mubr.msk.bf16.mxu1 %vm3603_vm0, %v3602_v28  ;;  %v3102_v62 = vld [vmem:[%s4115_s30 + $0x158] ss:$28 sps:$4 sm:$0xff]  }
 0x62e   : > { %v1115_v3 = vpop.f32.mrb[12].mxu0  ;;  %2837 = vmatpush3.bf16.msra.mxu0 %v3060_v0  ;;  %v3110_v0 = vld [vmem:[%s4115_s30 + $0x194] ss:$28 sps:$4 sm:$0xff]  }
 0x62f   : > { %v1166_v4 = vpack.c.bf16 %v1115_v3, %v1115_v3  ;;  %v2810_v5 = vpop.f32.mrb[13].mxu0  ;;  %2845 = vmatpush3.bf16.msra.mxu1 %v3062_v2  ;;  %1776 = vmatprep.subr.bf16.mxu0 %v3065_v14  ;;  %v3105_v2 = vld [vmem:[%s4115_s30 + $0x188] ss:$28 sps:$4 sm:$0xff]   ;;  %v3108_v3 = vld [vmem:[%s4115_s30 + $0x190] ss:$28 sps:$4 sm:$0xff]  }
 0x630   : > { %v1118_v6 = vpop.f32.mrb[14].mxu0  ;;  %1817 = vmatprep.subr.bf16.mxu1 %v3068_v17  ;;  %v3115_v17 = vld [vmem:[%s4115_s30 + $0x48] ss:$28 sps:$4 sm:$0xff]  }
 0x631   : > { %v2811_v7 = vpop.f32.mrb[15].mxu0  ;;  %2839 = vmatmul.mubr.msk.bf16.vlgmr.msra.gmra.mrb[20].mxu0 %vm751_vm1, %v1166_v4  ;;  %v3113_v4 = vld [vmem:[%s4115_s30 + $0x14] ss:$28 sps:$4 sm:$0xff]  }
 0x632   : > { %1808 = vmatprep.mubr.bf16.mxu0 %v3601_v16  ;;  %1777 = vmatpush1.bf16.msra.mxu0 %v3063_v13  ;;  %v3114_v13 = vld [vmem:[%s4115_s30 + $0x18] ss:$28 sps:$4 sm:$0xff]  }
 0x633   : > { %1778 = vmatprep.subr.bf16.mxu0 %v3071_v18  ;;  %v3118_v18 = vld [vmem:[%s4115_s30 + $0x50] ss:$28 sps:$4 sm:$0xff]  }
 0x635   : > { %v1158_v8 = vpop.f32.mrb[16].mxu1 }
 0x636   : > { %v1167_v9 = vpack.c.bf16 %v1158_v8, %v1158_v8  ;;  %v2816_v10 = vpop.f32.mrb[17].mxu1  ;;  %1779 = vmatpush1.bf16.msra.mxu0 %v3069_v20  ;;  %v3119_v20 = vld [vmem:[%s4115_s30 + $0x80] ss:$28 sps:$4 sm:$0xff]  }
 0x637   : > { %v1161_v11 = vpop.f32.mrb[18].mxu1  ;;  %1780 = vmatprep.subr.bf16.mxu0 %v3077_v22  ;;  %v3125_v22 = vld [vmem:[%s4115_s30 + $0xbc] ss:$28 sps:$4 sm:$0xff]  }
 0x638   : > { %v2817_v12 = vpop.f32.mrb[19].mxu1  ;;  %2847 = vmatmul.mubr.msk.bf16.vlgmr.msra.gmra.mrb[24].mxu1 %vm751_vm1, %v1167_v9  ;;  %v2613_v9 = vld [vmem:[%s482_s18] ss:$0 sm:$0xff] }
 0x639   : > { %1849 = vmatprep.mubr.bf16.mxu1 %v3601_v16  ;;  %1818 = vmatpush1.bf16.msra.mxu1 %v3066_v15  ;;  %v3111_v12 = vld [vmem:[%s4115_s30 + $0x10] ss:$28 sps:$4 sm:$0xff]  }
 0x63a   : > { %1819 = vmatprep.subr.bf16.mxu1 %v3074_v19  ;;  %1781 = vmatpush1.bf16.msra.mxu0 %v3075_v24  ;;  %v3117_v15 = vld [vmem:[%s4115_s30 + $0x4c] ss:$28 sps:$4 sm:$0xff]   ;;  %v3121_v19 = vld [vmem:[%s4115_s30 + $0x84] ss:$28 sps:$4 sm:$0xff]  }
 0x63b   : > { %1782 = vmatprep.subr.bf16.mxu0 %v3083_v48  ;;  %v3126_v24 = vld [vmem:[%s4115_s30 + $0xc0] ss:$28 sps:$4 sm:$0xff]  }
 0x63c   : > { %v3155_v48 = vld [vmem:[%s4122_s24 + $0x58] sm:$0xff]  }
 0x63d   : > { %1820 = vmatpush1.bf16.msra.mxu1 %v3072_v21  ;;  %v3122_v21 = vld [vmem:[%s4115_s30 + $0x88] ss:$28 sps:$4 sm:$0xff]  }
 0x63e   : > { %1821 = vmatprep.subr.bf16.mxu1 %v3080_v23  ;;  %1783 = vmatpush1.bf16.msra.mxu0 %v3081_v50  ;;  %v3123_v23 = vld [vmem:[%s4115_s30 + $0xb8] ss:$28 sps:$4 sm:$0xff]  }
 0x63f   : > { %v3157_v50 = vld [vmem:[%s4122_s24 + $0x18] sm:$0xff]  }
 0x641   : > { %1822 = vmatpush1.bf16.msra.mxu1 %v3078_v25  ;;  %v3129_v25 = vld [vmem:[%s4115_s30 + $0xf4] ss:$28 sps:$4 sm:$0xff]  }
 0x642   : > { %1823 = vmatprep.subr.bf16.mxu1 %v3086_v49  ;;  %v3150_v49 = vld [vmem:[%s4122_s24 + $0xa0] sm:$0xff]  }
 0x645   : > { %1824 = vmatpush1.bf16.msra.mxu1 %v3084_v51 }
 0x646   : > { %1825 = vmatprep.subr.bf16.mxu1 %v3092_v52  ;;  %v3158_v52 = vld [vmem:[%s4122_s24 + $0x60] sm:$0xff]  }
 0x649   : > { %1826 = vmatpush1.bf16.msra.mxu1 %v3090_v54 }
 0x64a   : > { %1827 = vmatprep.subr.bf16.mxu1 %v3098_v56 }
 0x64d   : > { %1828 = vmatpush1.bf16.msra.mxu1 %v3096_v58 }
 0x64e   : > { %1829 = vmatprep.subr.bf16.mxu1 %v3104_v60  ;;  %v3160_v60 = vld [vmem:[%s4122_s24 + $0x20] sm:$0xff]  }
 0x651   : > { %1830 = vmatpush1.bf16.msra.mxu1 %v3102_v62  ;;  %v3156_v62 = vld [vmem:[%s4122_s24 + $0xb0] sm:$0xff]  }
 0x652   : > { %1831 = vmatprep.subr.bf16.mxu1 %v3110_v0  ;;  %v3159_v0 = vld [vmem:[%s4122_s24 + $0xb8] sm:$0xff]  }
 0x655   : > { %1832 = vmatpush1.bf16.msra.mxu1 %v3108_v3  ;;  %v3164_v3 = vld [vmem:[%s4122_s24 + $0x70] sm:$0xff]  }
 0x656   : > { %2850 = vmatprep.subr.bf16.mxu1 %v3602_v28 }
 0x6fc   : > { %v1233_v26 = vpop.f32.mrb[16].mxu0  ;;  %v1288_v27 = vpop.f32.mrb[20].mxu1 }
 0x6fd   : > { %v1404_v29 = vadd.f32 %v1288_v27, %v1233_v26  ;;  %v2824_v30 = vpop.f32.mrb[17].mxu0  ;;  %v2832_v32 = vpop.f32.mrb[21].mxu1  ;;  %v3127_v26 = vld [vmem:[%s4115_s30 + $0xf0] ss:$28 sps:$4 sm:$0xff]   ;;  %v3130_v27 = vld [vmem:[%s4115_s30 + $0xf8] ss:$28 sps:$4 sm:$0xff]  }
 0x6fe   : > { %v1236_v33 = vpop.f32.mrb[18].mxu0  ;;  %v1291_v34 = vpop.f32.mrb[22].mxu1  ;;  %v3131_v30 = vld [vmem:[%s4115_s30 + $0x128] ss:$28 sps:$4 sm:$0xff]   ;;  %v3134_v32 = vld [vmem:[%s4115_s30 + $0x130] ss:$28 sps:$4 sm:$0xff]  }
 0x6ff   : > { %v2825_v35 = vpop.f32.mrb[19].mxu0  ;;  %v2833_v36 = vpop.f32.mrb[23].mxu1  ;;  %v3137_v33 = vld [vmem:[%s4115_s30 + $0x164] ss:$28 sps:$4 sm:$0xff]  }
 0x700   : > { %v3135_v34 = vld [vmem:[%s4115_s30 + $0x160] ss:$28 sps:$4 sm:$0xff]   ;;  %v3138_v35 = vld [vmem:[%s4115_s30 + $0x168] ss:$28 sps:$4 sm:$0xff]  }
 0x701   : > { %v3141_v36 = vld [vmem:[%s4115_s30 + $0x19c] ss:$28 sps:$4 sm:$0xff]  }
 0x704   : > { %v1343_v37 = vpop.f32.mrb[20].mxu0 }
 0x705   : > { %v1405_v31 = vadd.f32 %v1404_v29, %v1343_v37  ;;  %v2840_v38 = vpop.f32.mrb[21].mxu0  ;;  %v3133_v29 = vld [vmem:[%s4115_s30 + $0x12c] ss:$28 sps:$4 sm:$0xff]   ;;  %v3139_v37 = vld [vmem:[%s4115_s30 + $0x198] ss:$28 sps:$4 sm:$0xff]  }
 0x706   : > { %v1346_v39 = vpop.f32.mrb[22].mxu0  ;;  %v3143_v38 = vld [vmem:[%s4122_s24 + $0x80] sm:$0xff]  }
 0x707   : > { %v2841_v40 = vpop.f32.mrb[23].mxu0  ;;  %v3144_v39 = vld [vmem:[%s4122_s24 + $0x88] sm:$0xff]  }
 0x708   : > { %v3146_v40 = vld [vmem:[%s4122_s24 + $0x40] sm:$0xff]  }
 0x70b   : > { %v1398_v41 = vpop.f32.mrb[24].mxu1 }
 0x70c   : > { %v1406_v42 = vadd.f32 %v1405_v31, %v1398_v41  ;;  %v2848_v43 = vpop.f32.mrb[25].mxu1  ;;  %v3142_v31 = vld [vmem:[%s4115_s30 + $0x1a0] ss:$28 sps:$4 sm:$0xff]  }
 0x70d   : > { %v1401_v44 = vpop.f32.mrb[26].mxu1  ;;  %v3148_v41 = vld [vmem:[%s4122_s24] sm:$0xff]   ;;  %v3151_v43 = vld [vmem:[%s4122_s24 + $0x8] sm:$0xff]  }
 0x70e   : > { %v4253_v45 = vadd.f32 %v1406_v42, %v4131_v1  ;;  %v2849_v46 = vpop.f32.mrb[27].mxu1  ;;  %v3089_v1 = vld [vmem:[%s4115_s30 + $0xe4] ss:$28 sps:$4 sm:$0xff]   ;;  %v3149_v42 = vld [vmem:[%s4122_s24 + $0x48] sm:$0xff]   ;;  %v3152_v44 = vld [vmem:[%s4122_s24 + $0x50] sm:$0xff]  }
 0x70f   : > { %1784 = vmatprep.subr.bf16.mxu0 %v3089_v1  ;;  %v3147_v46 = vld [vmem:[%s4122_s24 + $0x98] sm:$0xff]  }
 0x710   : > { %v1409_v47 = vmul.f32 %v4253_v45, %v4253_v45  ;;  %1785 = vmatpush1.bf16.msra.mxu0 %v3087_v53 }
 0x711   : > { %1786 = vmatprep.subr.bf16.mxu0 %v3095_v55 }
 0x712   : > { %1410 = vadd.xlane.f32.xlu1 %v1409_v47  ;;  %v3154_v47 = vld [vmem:[%s4122_s24 + $0x10] sm:$0xff]  }
 0x714   : > { %1787 = vmatpush1.bf16.msra.mxu0 %v3093_v57  ;;  %v3153_v57 = vld [vmem:[%s4122_s24 + $0xa8] sm:$0xff]  }
 0x715   : > { %1788 = vmatprep.subr.bf16.mxu0 %v3101_v59 }
 0x718   : > { %1789 = vmatpush1.bf16.msra.mxu0 %v3099_v61  ;;  %v3161_v61 = vld [vmem:[%s4122_s24 + $0x68] sm:$0xff]  }
 0x719   : > { %1790 = vmatprep.subr.bf16.mxu0 %v3107_v63  ;;  %v3163_v63 = vld [vmem:[%s4122_s24 + $0x28] sm:$0xff]  }
 0x71c   : > { %1791 = vmatpush1.bf16.msra.mxu0 %v3105_v2  ;;  %v3162_v2 = vld [vmem:[%s4122_s24 + $0xc0] sm:$0xff]  }
 0x71d   : > { %1858 = vmatprep.subr.bf16.mxu0 %v3113_v4  ;;  %v3165_v4 = vld [vmem:[%s4122_s24 + $0xc8] sm:$0xff]  }
 0x79f   : > { %v1411_v5 = vpop.xlane.xlu1 %1410 }
 0x7a0   : > { %v1412_v6 = vmul.f32 0.0078125, %v1411_v5  ;;  %v3166_v5 = vld [vmem:[%s4122_s24 + $0x30] sm:$0xff]  }
 0x7a2   : > { %v1413_v7 = vadd.f32 1e-06, %v1412_v6  ;;  %v3167_v6 = vld [vmem:[%s4122_s24 + $0x78] sm:$0xff]  }
 0x7a4   : > { %3189 = vrsqrt.f32 %v1413_v7  ;;  %v3168_v7 = vld [vmem:[%s4122_s24 + $0xd0] sm:$0xff]  }
 0x7ae   : > { %v3190_v8 = vpop.eup %3189 }
 0x7af   : > { %v1415_v10 = vmul.f32 %v3190_v8, %v4253_v45  ;;  %v3169_v8 = vld [vmem:[%s4122_s24 + $0x38] sm:$0xff]  }
 0x7b1   : > { %v1422_v11 = vmul.f32 %v2613_v9, %v1415_v10  ;;  %v3170_v9 = vld [vmem:[%s4122_s24 + $0xd8] sm:$0xff]  }
 0x7b3   : > { %v1423_v14 = vpack.c.bf16 %v1422_v11, %v1422_v11 }
 0x7b5   : > { %1809 = vmatmul.mubr.bf16.vlgmr.msra.gmra.mrb[24].mxu0 %v1423_v14  ;;  %1850 = vmatmul.mubr.bf16.vlgmr.msra.gmra.mrb[28].mxu1 %v1423_v14 }
 0x7b6   : > { %1859 = vmatpush1.bf16.msra.mxu0 %v3111_v12  ;;  %2851 = vmatpush3.bf16.msra.mxu1 %v3114_v13 }
 0x7b7   : > { %1860 = vmatprep.subr.bf16.mxu0 %v3117_v15  ;;  %2852 = vmatprep.subr.bf16.mxu1 %v3602_v28 }
 0x7b8   : > { %1890 = vmatprep.mubr.bf16.mxu0 %v3601_v16  ;;  %2866 = vmatprep.mubr.msk.bf16.mxu1 %vm3603_vm0, %v3602_v28 }
 0x7ba   : > { %1861 = vmatpush1.bf16.msra.mxu0 %v3115_v17  ;;  %2853 = vmatpush3.bf16.msra.mxu1 %v3118_v18 }
 0x7bb   : > { %1862 = vmatprep.subr.bf16.mxu0 %v3121_v19  ;;  %2854 = vmatprep.subr.bf16.mxu1 %v3602_v28 }
 0x7be   : > { %1863 = vmatpush1.bf16.msra.mxu0 %v3119_v20  ;;  %2855 = vmatpush3.bf16.msra.mxu1 %v3122_v21 }
 0x7bf   : > { %1864 = vmatprep.subr.bf16.mxu0 %v3125_v22  ;;  %2856 = vmatprep.subr.bf16.mxu1 %v3602_v28 }
 0x7c2   : > { %1865 = vmatpush1.bf16.msra.mxu0 %v3123_v23  ;;  %2857 = vmatpush3.bf16.msra.mxu1 %v3126_v24 }
 0x7c3   : > { %1866 = vmatprep.subr.bf16.mxu0 %v3129_v25  ;;  %2858 = vmatprep.subr.bf16.mxu1 %v3602_v28 }
 0x7c6   : > { %1867 = vmatpush1.bf16.msra.mxu0 %v3127_v26  ;;  %2859 = vmatpush3.bf16.msra.mxu1 %v3130_v27 }
 0x7c7   : > { %1868 = vmatprep.subr.bf16.mxu0 %v3133_v29  ;;  %2860 = vmatprep.subr.bf16.mxu1 %v3602_v28 }
 0x7ca   : > { %1869 = vmatpush1.bf16.msra.mxu0 %v3131_v30  ;;  %2861 = vmatpush3.bf16.msra.mxu1 %v3134_v32 }
 0x7cb   : > { %1870 = vmatprep.subr.bf16.mxu0 %v3137_v33  ;;  %2862 = vmatprep.subr.bf16.mxu1 %v3602_v28 }
 0x7ce   : > { %1871 = vmatpush1.bf16.msra.mxu0 %v3135_v34  ;;  %2863 = vmatpush3.bf16.msra.mxu1 %v3138_v35 }
 0x7cf   : > { %1872 = vmatprep.subr.bf16.mxu0 %v3141_v36  ;;  %2864 = vmatprep.subr.bf16.mxu1 %v3602_v28  ;;  %v3145_v28 = vld [vmem:[%s4122_s24 + $0x90] sm:$0xff]  }
 0x7d2   : > { %1873 = vmatpush1.bf16.msra.mxu0 %v3139_v37  ;;  %2865 = vmatpush3.bf16.msra.mxu1 %v3142_v31 }
 0x7d3   : > { %2262 = vmatprep.subr.bf16.mxu1 %v3601_v16  ;;  %2748 = vmatprep.subr.bf16.mxu0 %v3146_v40 }
 0x7d5   : > { %1891 = vmatmul.mubr.bf16.vlgmr.msra.gmra.mrb[28].mxu0 %v1423_v14  ;;  %2867 = vmatmul.mubr.bf16.vlgmr.msra.gmra.mrb[32].mxu1 %v1423_v14 }
 0x7d6   : > { %2263 = vmatpush1.bf16.msra.mxu1 %v3143_v38  ;;  %2749 = vmatpush3.bf16.msra.mxu0 %v3148_v41 }
 0x7d7   : > { %2264 = vmatprep.subr.bf16.mxu1 %v3601_v16  ;;  %2750 = vmatprep.subr.bf16.mxu0 %v3149_v42 }
 0x7da   : > { %2265 = vmatpush1.bf16.msra.mxu1 %v3144_v39  ;;  %2751 = vmatpush3.bf16.msra.mxu0 %v3151_v43 }
 0x7db   : > { %2266 = vmatprep.subr.bf16.mxu1 %v3601_v16  ;;  %2752 = vmatprep.subr.bf16.mxu0 %v3152_v44 }
 0x7de   : > { %2267 = vmatpush1.bf16.msra.mxu1 %v3145_v28  ;;  %2753 = vmatpush3.bf16.msra.mxu0 %v3154_v47 }
 0x7df   : > { %2268 = vmatprep.subr.bf16.mxu1 %v3601_v16  ;;  %2754 = vmatprep.subr.bf16.mxu0 %v3155_v48 }
 0x7e2   : > { %2269 = vmatpush1.bf16.msra.mxu1 %v3147_v46  ;;  %2755 = vmatpush3.bf16.msra.mxu0 %v3157_v50 }
 0x7e3   : > { %2270 = vmatprep.subr.bf16.mxu1 %v3601_v16  ;;  %2756 = vmatprep.subr.bf16.mxu0 %v3158_v52 }
 0x7e6   : > { %2271 = vmatpush1.bf16.msra.mxu1 %v3150_v49  ;;  %2757 = vmatpush3.bf16.msra.mxu0 %v3160_v60 }
 0x7e7   : > { %2272 = vmatprep.subr.bf16.mxu1 %v3601_v16  ;;  %2758 = vmatprep.subr.bf16.mxu0 %v3161_v61 }
 0x7ea   : > { %2273 = vmatpush1.bf16.msra.mxu1 %v3153_v57  ;;  %2759 = vmatpush3.bf16.msra.mxu0 %v3163_v63 }
 0x7eb   : > { %2274 = vmatprep.subr.bf16.mxu1 %v3601_v16  ;;  %2760 = vmatprep.subr.bf16.mxu0 %v3164_v3 }
 0x7ee   : > { %2275 = vmatpush1.bf16.msra.mxu1 %v3156_v62  ;;  %2761 = vmatpush3.bf16.msra.mxu0 %v3166_v5 }
 0x7ef   : > { %2276 = vmatprep.subr.bf16.mxu1 %v3601_v16  ;;  %2762 = vmatprep.subr.bf16.mxu0 %v3167_v6  ;;  %v2704_v6 = vld [vmem:[#allocation15] ss:$0 sm:$0xff] (!%p2703_p3) }
 0x7f2   : > { %2277 = vmatpush1.bf16.msra.mxu1 %v3159_v0  ;;  %2763 = vmatpush3.bf16.msra.mxu0 %v3169_v8 }
 0x7f3   : > { %2278 = vmatprep.subr.bf16.mxu1 %v3601_v16 }
 0x7f6   : > { %2279 = vmatpush1.bf16.msra.mxu1 %v3162_v2 }
 0x7f7   : > { %2280 = vmatprep.subr.bf16.mxu1 %v3601_v16 }
 0x7fa   : > { %2281 = vmatpush1.bf16.msra.mxu1 %v3165_v4 }
 0x7fb   : > { %2282 = vmatprep.subr.bf16.mxu1 %v3601_v16 }
 0x7fe   : > { %2283 = vmatpush1.bf16.msra.mxu1 %v3168_v7 }
 0x7ff   : > { %2284 = vmatprep.subr.bf16.mxu1 %v3601_v16 }
 0x802   : > { %2285 = vmatpush1.bf16.msra.mxu1 %v3170_v9 }
 0x888   : > { %v4333_v51 = vpop.f32.mrb[24].mxu0  ;;  %v4335_v1 = vpop.f32.mrb[28].mxu1 }
 0x889   : > { %v4338_v53 = vpop.f32.mrb[25].mxu0  ;;  %v4340_v54 = vpop.f32.mrb[29].mxu1  ;;  %v2670_v19 = vmul.f32 -1.442695, %v4333_v51  ;;  %v2672_v21 = vmul.f32 -1.442695, %v4335_v1 }
 0x88a   : > { %1971 = vrot.lane.b32.xlu0 %v4340_v54, %s3605_s5  ;;  %v1814_v55 = vpop.f32.mrb[26].mxu0  ;;  %v1855_v56 = vpop.f32.mrb[30].mxu1  ;;  %v2671_v16 = vmul.f32 -1.442695, %v4338_v53  ;;  %v2673_v20 = vmul.f32 -1.442695, %v4340_v54 }
 0x88b   : > { %v1815_v58 = vpop.f32.mrb[27].mxu0  ;;  %v1856_v59 = vpop.f32.mrb[31].mxu1  ;;  %3191 = vpow2.f32 %v2670_v19 }
 0x88c   : > { %3193 = vpow2.f32 %v2671_v16 }
 0x88d   : > { %3195 = vpow2.f32 %v2673_v20 }
 0x88e   : > { %3197 = vpow2.f32 %v2672_v21 }
 0x895   : > { %v3192_v22 = vpop.eup %3191 }
 0x896   : > { %v3194_v23 = vpop.eup %3193  ;;  %v1951_v24 = vadd.f32 1.0, %v3192_v22 }
 0x897   : > { %v3196_v25 = vpop.eup %3195  ;;  %v1952_v26 = vadd.f32 1.0, %v3194_v23 }
 0x898   : > { %v3198_v27 = vpop.eup %3197  ;;  %3199 = vrcp.f32 %v1951_v24  ;;  %v1954_v29 = vadd.f32 1.0, %v3196_v25 }
 0x899   : > { %v1953_v30 = vadd.f32 1.0, %v3198_v27  ;;  %3201 = vrcp.f32 %v1952_v26 }
 0x89a   : > { %3203 = vrcp.f32 %v1954_v29 }
 0x89b   : > { %3205 = vrcp.f32 %v1953_v30 }
 0x8a2   : > { %v3200_v33 = vpop.eup %3199 }
 0x8a3   : > { %v3202_v35 = vpop.eup %3201  ;;  %v1963_v37 = vmul.f32 %v3200_v33, %v4333_v51 }
 0x8a4   : > { %v3204_v31 = vpop.eup %3203  ;;  %v1964_v38 = vmul.f32 %v3202_v35, %v4338_v53 }
 0x8a5   : > { %v3206_v40 = vpop.eup %3205  ;;  %v1966_v43 = vmul.f32 %v3204_v31, %v4340_v54 }
 0x8a6   : > { %v1965_v44 = vmul.f32 %v3206_v40, %v4335_v1 }
 0x8a8   : > { %v1892_v10 = vpop.f32.mrb[28].mxu0  ;;  %v1933_v11 = vpop.f32.mrb[32].mxu1 }
 0x8a9   : > { %v2868_v12 = vpop.f32.mrb[33].mxu1  ;;  %1973 = vrot.lane.b32.xlu0 %v1892_v10, %s3605_s5  ;;  %v1894_v13 = vpop.f32.mrb[29].mxu0 }
 0x8aa   : > { %v1896_v14 = vpop.f32.mrb[30].mxu0  ;;  %v1936_v15 = vpop.f32.mrb[34].mxu1 }
 0x8ab   : > { %v1897_v17 = vpop.f32.mrb[31].mxu0  ;;  %v2869_v18 = vpop.f32.mrb[35].mxu1 }
 0x8ad   : > { %1975 = vrot.lane.b32.xlu0 %v1894_v13, %s3605_s5 }
 0x8b1   : > { %1977 = vrot.lane.b32.xlu0 %v1933_v11, %s3605_s5 }
 0x8fc   : > { %v1972_v32 = vpop.permute.xlu0 %1971 }
 0x91b   : > { %v1974_v34 = vpop.permute.xlu0 %1973 }
 0x91c   : > { %v1980_v36 = vsel %vm1979_vm4, %v1972_v32, %v1974_v34 }
 0x91d   : > { %v1987_v41 = vmul.f32 %v1980_v36, %v1963_v37 }
 0x91f   : > { %v1976_v39 = vpop.permute.xlu0 %1975  ;;  %v1991_v48 = vpack.c.bf16 %v1987_v41, %v1987_v41 }
 0x920   : > { %v1981_v42 = vsel %vm1979_vm4, %v1974_v34, %v1976_v39 }
 0x921   : > { %v1988_v28 = vmul.f32 %v1981_v42, %v1964_v38 }
 0x923   : > { %v1992_v46 = vpack.c.bf16 %v1988_v28, %v1988_v28  ;;  %v1978_v47 = vpop.permute.xlu0 %1977 }
 0x924   : > { %v1982_v49 = vsel %vm1979_vm4, %v1976_v39, %v1978_v47  ;;  %v1990_v50 = vmul.f32 %v1978_v47, %v1966_v43 }
 0x925   : > { %v1989_v51 = vmul.f32 %v1982_v49, %v1965_v44  ;;  %2254 = vmatprep.mubr.bf16.mxu0 %v1992_v46 }
 0x926   : > { %v1994_v52 = vpack.c.bf16 %v1990_v50, %v1990_v50  ;;  %2255 = vmatmul.mubr.bf16.vlgmr.msra.gmra.mrb[32].mxu0 %v1991_v48 }
 0x927   : > { %v1993_v53 = vpack.c.bf16 %v1989_v51, %v1989_v51 }
 0x928   : > { %2702 = vmatprep.mubr.msk.bf16.mxu1 %vm1979_vm4, %v1994_v52 }
 0x929   : > { %2295 = vmatmul.mubr.bf16.vlgmr.msra.gmra.mrb[36].mxu1 %v1993_v53 }
 0x9f9   : > { %v2764_v55 = vpop.f32.mrb[32].mxu0 }
 0x9fa   : > { %v2765_v56 = vpop.f32.mrb[33].mxu0 }
 0x9fb   : > { %v2766_v57 = vadd.f32 %v2765_v56, %v2764_v55  ;;  %v2767_v54 = vpop.f32.mrb[34].mxu0  ;;  %2307 = sbr.rel (%p2703_p3) target bundleno = 2725 (0xaa5), region = 92 }
 0x9fc   : > { %v2768_v58 = vpop.f32.mrb[35].mxu0  ;;  %v2296_v1 = vpop.f32.mrb[36].mxu1 }
 0x9fd   : > { %v2297_v59 = vadd.f32 %v2766_v57, %v2296_v1  ;;  %v2298_v60 = vpop.f32.mrb[37].mxu1 }
 0x9fe   : > { %v2299_v61 = vpop.f32.mrb[38].mxu1 }
 0x9ff   : > { %v2302_v62 = vadd.f32 %v2297_v59, %v4253_v45  ;;  %v2300_v63 = vpop.f32.mrb[39].mxu1 }
 0xa01   : > { %2303 = vst [vmem:[#allocation2] sm:$0xff] %v2302_v62  ;;  %v2309_v0 = vmul.f32 (!%p2703_p3), %v2302_v62, %v2302_v62 }
 0xa03   : > { %2310 = vadd.xlane.f32.xlu0 %v2309_v0 }
 0xa90   : > { %v2311_v2 = vpop.xlane.xlu0 %2310 }
 0xa91   : > { %v2312_v3 = vmul.f32 0.0078125, %v2311_v2 }
 0xa93   : > { %v2313_v4 = vadd.f32 1e-06, %v2312_v3 }
 0xa95   : > { %3207 = vrsqrt.f32 %v2313_v4 }
 0xa9f   : > { %v3208_v5 = vpop.eup %3207 }
 0xaa0   : > { %v2315_v7 = vmul.f32 %v3208_v5, %v2302_v62 }
 0xaa2   : > { %v2322_v8 = vmul.f32 %v2704_v6, %v2315_v7 }
 0xaa4   : > { %2323 = vst [vmem:[%s4128_s0] sm:$0xff] %v2322_v8 }
 0xaa5 PF: > { %s4548_s17 = sld [smem:[#allocation26_spill]]  ;;  %s4549_s26 = sld [smem:[#allocation31_spill]] }
 0xaa6   : > { %s4550_s20 = sld [smem:[#allocation42_spill]]  ;;  %s2338_s7 = sshll.u32 %s4128_s0, 4  ;;  %s2339_s7 = int_to_ptr.vmem [resolvable:$true] %s2338_s7 }
 0xaa7   : > { %s2325_s23 = scalar_lea.sflag [#allocation5], %s4086_s12  ;;  %s3447_s2 = scalar_lea.vmem %s2339_s7, 128 }
 0xaa8   : > { %p3448_p1 = scmp.ne.s32.totalorder %s2339_s7, %s3447_s2  ;;  %s3607_s8 = smov [#allocation17]  }
 0xaa9   : > { %s3451_s18 = sshll.u32 %s3607_s8, 4  ;;  %s3452_s18 = int_to_ptr.vmem [resolvable:$false] %s3451_s18 }
 0xaaa   : > { %s3453_s11 = scalar_lea.vmem %s3452_s18, 256  ;;  %p3454_p8 = scmp.lt.s32.totalorder %s2339_s7, %s3452_s18 }
 0xaab   : > { %s2706_s27 = sshll.u32 %s4548_s17, 7  ;;  %p4551_p0 = scmp.ne.s32.totalorder %s4549_s26, 0 }
 0xaac   : > { %s4387_s6 = scalar_lea.hbm %s4550_s20, %s2706_s27  ;;  %p3455_p10 = scmp.lt.s32.totalorder %s3453_s11, %s3447_s2 }
 0xaad   : > { %p3449_p4 = pnand %p3448_p1, %p4551_p0 }
 0xaae   : > { %p3456_p2 = por %p3455_p10, %p3454_p8 }
 0xaaf   : > { %p3450_p9 = pneg %p3449_p4 }
 0xab1   : > { %p3457_p6 = pnand %p3456_p2, %p3450_p9 }
 0xab3   : > { %3460 = shalt.err (!%p3457_p6)
}
 0xab4   : > { %s3461_s12 = scalar_lea.hbm %s4387_s6, 128  ;;  %s3465_s24 = scalar_lea.hbm %s4550_s20, 256 }
 0xab5   : > { %p3462_p13 = scmp.ne.s32.totalorder %s4387_s6, %s3461_s12  ;;  %p3466_p11 = scmp.lt.u32.totalorder %s4387_s6, %s4550_s20 }
 0xab6   : > { %p3467_p12 = scmp.lt.u32.totalorder %s3465_s24, %s3461_s12  ;;  %p3469_p1 = scmp.lt.u32.totalorder %s3461_s12, %s4387_s6 }
 0xab7   : > { %p3463_p7 = pnand %p3462_p13, %p4551_p0 }
 0xab8   : > { %p3468_p3 = por %p3467_p12, %p3466_p11 }
 0xab9   : > { %p3464_p5 = pneg %p3463_p7 }
 0xaba   : > { %p3470_p4 = por %p3469_p1, %p3468_p3 }
 0xabc   : > { %p3471_p9 = pnand %p3470_p4, %p3464_p5 }
 0xabe   : > { %3474 = shalt.err (!%p3471_p9)
}
 0xabf   : > { %2894 = dma.vmem_to_hbm [thread:$0]  (%p4551_p0), %s2339_s7, 128, %s4387_s6, %s2325_s23  }
 0xac0 PF: > { %s4552_s16 = sld [smem:[#allocation24_spill]]  ;;  %s4553_s5 = sld [smem:[#allocation29_spill]] }
 0xac1   : > { %p2929_p8 = scmp.ge.s32.totalorder %s3585_s15, 2 }
 0xac6   : > { %s2350_s4 = sand.u32 1, %s4552_s16   ;;  %p4554_p10 = scmp.ne.s32.totalorder %s4553_s5, 0 }
 0xac7   : > { %s2351_s25 = scalar_lea.sflag [#allocation5], %s2350_s4 }
 0xac8   : > { %p2923_p2 = pnand %p2929_p8, %p4554_p10 }
 0xaca   : > { %3540 = dma.done.wait (!%p2923_p2), %s2351_s25, 128  }
 0xacb   : > { %3542 = vsyncadd (!%p2923_p2), %s2351_s25, 4294967168  ;;  %s34_s15 = sadd.s32 1, %s3585_s15   ;;  %s4555_s17 = sld [smem:[#allocation33_spill]] }
 0xacc   : > { %p31_p6 = scmp.ge.s32.totalorder %s34_s15, 6   ;;  %s4556_s12 = sld [smem:[#allocation27_spill]] }
 0xacd   : > { %s4557_s26 = sld [smem:[#allocation30_spill]]  ;;  %s4558_s14 = sld [smem:[#allocation32_spill]] }
 0xace   : > { %s4559_s27 = smov %s3549_s28  ;;  %s4560_s28 = smov %s3553_s29 }
 0xacf   : > { %s4561_s29 = smov %s3940_s3  ;;  %s4562_s30 = smov %s3561_s9 }
 0xad0   : > { %s4563_s9 = smov %s3565_s10  ;;  %s4565_s11 = smov %s3577_s13 }
 0xad1   : > { %s4564_s10 = smov %s4555_s17  ;;  %33 = sbr.rel (!%p31_p6) target bundleno = 26 (0x1a), region = 181 }
 0xad3   : > { %s4566_s13 = smov %s4557_s26 }
 0xad8   :  { %2356 = vsyncpa [#allocation4], 1 }
 0xad9   :  { %2358 = vsyncpa [#allocation4 + $0x1], 1 }
 0xada   :  { %2359 = vsyncpa [#allocation7], 1 }
 0xadb   :  { %2361 = vsyncpa [#allocation7 + $0x1], 1 }
 0xadc   :  { %2362 = vsyncpa [#allocation10], 1 }
 0xadd   :  { %2364 = vsyncpa [#allocation10 + $0x1], 1 }
 0xade   :  { %2365 = vsyncpa [#allocation13], 1 }
 0xadf   :  { %2367 = vsyncpa [#allocation13 + $0x1], 1 }
 0xae0   :  { %2368 = vsyncpa [#allocation16], 1 }
 0xae1   :  { %2369 = vsyncpa [#allocation5], 1 }
 0xae2   :  { %2371 = vsyncpa [#allocation5 + $0x1], 1 }

</bundles_post_ra>
